<compile_context>
chip_gen: v5e
topology: v5e:2x2
jax: 0.10.0
libtpu: 0.0.40
codegen_flags: <defaults>
</compile_context>

<pallas_src>
import jax
import jax.numpy as jnp
from jax.experimental import pallas as pl
from jax.experimental.pallas import tpu as pltpu

# ----------------------------- model config -----------------------------
VOCAB_SZ = 16
EMBED_SZ = 32
HIDDEN_SZ = 64
OUT_SZ = 48
NUM_LAYERS = 2          # fused kernel hardcodes the 2-layer chain
BLANK = 0
BATCH = 2
SEQ = 8

BATCH_PAD = 8           # pad batch to one full sublane group
OUT_PAD = 128           # pad output Linear N to a full lane width
VOCAB_PAD = 128         # pad one-hot gather K to a full lane width


# ----------------------------- fused predictor kernel -----------------------------
def _make_predictor_kernel(T, Bp, H, vocabp, outp):
    TBp = T * Bp

    def kernel(tok_ref, h0_ref, table_ref, wh1_ref, w2_ref, b2_ref,
               wlin_ref, blin_ref, y_ref, hlast_ref, xp1_scr):
        f32 = jnp.float32
        bf16 = jnp.bfloat16

        # ---- hoisted: one-hot token gather through the folded (embed->ffn->Wx1)+bias
        # lookup table; a single (TBp, 128)@(128, 3H) bf16 MXU matmul covers all steps.
        lane = jax.lax.broadcasted_iota(jnp.int32, (TBp, vocabp), 1)
        onehot = jnp.where(lane == tok_ref[...], 1.0, 0.0).astype(bf16)
        xp1_scr[...] = jnp.dot(onehot, table_ref[...], preferred_element_type=f32)

        # ---- loop-invariant loads / broadcasts hoisted out of the static unroll ----
        wh1 = wh1_ref[...]                                # (H, 2H)   bf16
        w2 = w2_ref[...]                                  # (2H, 3H)  bf16
        b2 = jnp.broadcast_to(b2_ref[...], (Bp, 3 * H))   # broadcast once, not per step

        def sigmoid(x):                                   # EUP tanh form of sigmoid
            return 0.5 * (1.0 + jnp.tanh(0.5 * x))

        h1 = h0_ref[0]                                    # (Bp, H) f32 warm-start
        h2 = h0_ref[1]
        ys = []

        # Static unroll over time (T small). Per-step MXU work is exactly two lane-dense
        # bf16 pushes: h1 @ [Wha1|Whc1] (K=64, N=128) and [h1|h2] @ W2 (K=128, N=192).
        # Hidden states and per-step outputs stay in vregs.
        # TODO(synk): for long U / production sizes switch to a chunked grid/fori_loop
        #             over time (h carried in VMEM scratch, x-proj chunk auto-pipelined)
        #             and add a parallel batch grid axis for v7x's second TensorCore.
        for t in range(T):
            xp = xp1_scr[t * Bp:(t + 1) * Bp, :]          # (Bp, 3H), b1 already folded in
            hh = jnp.dot(h1.astype(bf16), wh1, preferred_element_type=f32)   # (Bp, 2H)
            a1 = 1.0 + jnp.tanh(xp[:, :H] + hh[:, :H])
            c1 = sigmoid(xp[:, H:2 * H] + hh[:, H:])
            cand1 = jnp.tanh(xp[:, 2 * H:] + a1 * h1)
            h1 = h1 + (1.0 - c1) * (cand1 - h1)           # == c1*h1 + (1-c1)*cand1

            h12 = jnp.concatenate([h1, h2], axis=1).astype(bf16)             # (Bp, 2H)
            g2 = jnp.dot(h12, w2, preferred_element_type=f32) + b2           # (Bp, 3H)
            a2 = 1.0 + jnp.tanh(g2[:, :H])
            c2 = sigmoid(g2[:, H:2 * H])
            cand2 = jnp.tanh(g2[:, 2 * H:] + a2 * h2)
            h2 = h2 + (1.0 - c2) * (cand2 - h2)
            ys.append(h2)                                 # kept in vregs (no scratch)

        # ---- hoisted output Linear over all timesteps, lane-padded to 128 cols ----
        y2 = jnp.concatenate(ys, axis=0).astype(bf16)     # (TBp, H)
        y = jnp.dot(y2, wlin_ref[...], preferred_element_type=f32) + blin_ref[...]
        y_ref[...] = y.reshape(T, Bp, outp).astype(y_ref.dtype)   # time-major output
        hlast_ref[0] = h1
        hlast_ref[1] = h2

    return kernel


def _fused_predictor(tok2d, h0, table, wh1, w2, b2, lin_w, lin_b):
    TBp = tok2d.shape[0]
    n_layers, Bp, H = h0.shape
    T = TBp // Bp
    vocabp, threeH = table.shape
    outp = lin_w.shape[1]
    vmem = pl.BlockSpec(memory_space=pltpu.MemorySpace.VMEM)
    return pl.pallas_call(
        _make_predictor_kernel(T, Bp, H, vocabp, outp),
        out_shape=(
            jax.ShapeDtypeStruct((T, Bp, outp), jnp.float32),      # time-major, lane-padded
            jax.ShapeDtypeStruct((n_layers, Bp, H), jnp.float32),  # final hidden states
        ),
        in_specs=[vmem] * 8,
        out_specs=(vmem, vmem),
        scratch_shapes=[
            pltpu.VMEM((TBp, threeH), jnp.float32),   # hoisted layer-1 x-projection
        ],
    )(tok2d, h0, table, wh1, w2, b2, lin_w, lin_b)


# ----------------------------- parameter init & packing -----------------------------
def init_params(key):
    ks = iter(jax.random.split(key, 32))

    def mat(shape, fan_in):
        return (jax.random.normal(next(ks), shape, jnp.float32)
                / jnp.sqrt(jnp.float32(fan_in)))

    def vec(shape):
        return 0.1 * jax.random.normal(next(ks), shape, jnp.float32)

    params = {}
    embed = jax.random.normal(next(ks), (VOCAB_SZ, EMBED_SZ), jnp.float32)
    embed = embed.at[BLANK].set(0.0)        # nn.Embedding padding_idx=blank row is zero
    params["embed"] = embed

    # NOTE: weights stored as (in_features, out_features); PyTorch nn.Linear weights
    # (out, in) must be transposed when porting.
    params["ffn_w"] = mat((EMBED_SZ, HIDDEN_SZ), EMBED_SZ)
    params["ffn_b"] = vec((HIDDEN_SZ,))

    params["rnn"] = []
    for _ in range(NUM_LAYERS):
        H = HIDDEN_SZ
        params["rnn"].append({
            "wxa": mat((H, H), H), "wha": mat((H, H), H), "ba": vec((H,)),
            "wxc": mat((H, H), H), "whc": mat((H, H), H), "bc": vec((H,)),
            "wxh": mat((H, H), H), "bh": vec((H,)),
        })

    params["lin_w"] = mat((HIDDEN_SZ, OUT_SZ), HIDDEN_SZ)
    params["lin_b"] = vec((OUT_SZ,))
    return params


def pack_params(params):
    """One-time layout plumbing (outside the jitted forward):
      * fold Embedding -> ffn -> layer-1 x-projection (+ biases) into a (128, 3H) table,
      * fuse per-gate nBRC weights into lane-dense matrices (layer-1 Wh trimmed to N=128,
        layer-2 Wx/Wh stacked along K into one (128, 3H) matrix),
      * pad the output Linear to 128 lanes,
      * store weight matrices as bf16 (MXU-native), biases stay f32."""
    H = HIDDEN_SZ
    hi = jax.lax.Precision.HIGHEST
    bf16 = jnp.bfloat16
    l1, l2 = params["rnn"]

    # Folded lookup table: table[v] = (embed[v] @ Wffn + bffn) @ [Wxa1|Wxc1|Wxh1] + b1
    wx1 = jnp.concatenate([l1["wxa"], l1["wxc"], l1["wxh"]], axis=1)            # (H, 3H)
    b1 = jnp.concatenate([l1["ba"], l1["bc"], l1["bh"]])                        # (3H,)
    embedffn = jnp.dot(params["embed"], params["ffn_w"], precision=hi) + params["ffn_b"]
    table = jnp.dot(embedffn, wx1, precision=hi) + b1                           # (V, 3H)
    table = jnp.pad(table, ((0, VOCAB_PAD - VOCAB_SZ), (0, 0)))                 # (128, 3H)

    # Layer-1 recurrent weights, candidate zero-block dropped -> lane-exact N=128.
    wh1 = jnp.concatenate([l1["wha"], l1["whc"]], axis=1)                       # (H, 2H)

    # Layer-2: Wx stacked over Wh along K -> one (2H, 3H) matrix, LHS = [h1 | h2].
    wx2 = jnp.concatenate([l2["wxa"], l2["wxc"], l2["wxh"]], axis=1)            # (H, 3H)
    wh2 = jnp.concatenate([l2["wha"], l2["whc"],
                           jnp.zeros((H, H), jnp.float32)], axis=1)             # (H, 3H)
    w2 = jnp.concatenate([wx2, wh2], axis=0)                                    # (2H, 3H)
    b2 = jnp.concatenate([l2["ba"], l2["bc"], l2["bh"]]).reshape(1, 3 * H)

    lin_w = jnp.pad(params["lin_w"], ((0, 0), (0, OUT_PAD - OUT_SZ)))
    lin_b = jnp.pad(params["lin_b"], (0, OUT_PAD - OUT_SZ)).reshape(1, OUT_PAD)

    return {
        "table": table.astype(bf16),
        "wh1": wh1.astype(bf16),
        "w2": w2.astype(bf16),
        "b2": b2,
        "lin_w": lin_w.astype(bf16),
        "lin_b": lin_b,
    }


# ----------------------------- forward -----------------------------
def predictor_forward(packed, tokens, state=None, lengths=None):
    # TODO(synk): `lengths` masking of padded timesteps (CustomCPURNN lengths path) and
    #             per-sequence final-state extraction at lengths[b]-1 are not implemented
    #             (lengths=None path only).
    del lengths
    B, U = tokens.shape
    Bp = BATCH_PAD
    assert B <= Bp

    # Only tiny int32 glue remains on the wrapper input side: time-major token ids with
    # the batch padded (with blank=0) to one full sublane group.
    tok = jnp.transpose(tokens.astype(jnp.int32))                 # (U, B)
    tok = jnp.pad(tok, ((0, 0), (0, Bp - B)))                     # (U, Bp)
    tok2d = tok.reshape(U * Bp, 1)

    if state is None:
        h0 = jnp.zeros((NUM_LAYERS, Bp, HIDDEN_SZ), jnp.float32)
    else:
        h0 = jnp.pad(state.astype(jnp.float32), ((0, 0), (0, Bp - B), (0, 0)))

    y_pad, h_last = _fused_predictor(
        tok2d, h0,
        packed["table"], packed["wh1"], packed["w2"], packed["b2"],
        packed["lin_w"], packed["lin_b"])

    # Kernel already emits time-major (U, Bp, OUT_PAD): one slice + one tiny transpose
    # back to the module's (B, U, out_sz) layout.
    y = jnp.transpose(y_pad[:, :B, :OUT_SZ], (1, 0, 2))
    new_state = h_last[:, :B, :]                                  # (num_layers, B, H)
    return y, new_state


# ----------------------------- pure-JAX reference -----------------------------
def predictor_reference(params, tokens, state=None):
    hi = jax.lax.Precision.HIGHEST
    B, U = tokens.shape
    x = params["embed"][tokens]
    x = jnp.dot(x, params["ffn_w"], precision=hi) + params["ffn_b"]
    h_prev = (jnp.zeros((NUM_LAYERS, B, HIDDEN_SZ), jnp.float32)
              if state is None else state.astype(jnp.float32))
    finals = []
    for l in range(NUM_LAYERS):
        lp = params["rnn"][l]
        h = h_prev[l]
        ys = []
        for t in range(U):
            xt = x[:, t, :]
            a = 1.0 + jnp.tanh(jnp.dot(xt, lp["wxa"], precision=hi)
                               + jnp.dot(h, lp["wha"], precision=hi) + lp["ba"])
            c = jax.nn.sigmoid(jnp.dot(xt, lp["wxc"], precision=hi)
                               + jnp.dot(h, lp["whc"], precision=hi) + lp["bc"])
            cand = jnp.tanh(jnp.dot(xt, lp["wxh"], precision=hi) + a * h + lp["bh"])
            h = c * h + (1.0 - c) * cand
            ys.append(h)
        x = jnp.stack(ys, axis=1)
        finals.append(h)
    y = jnp.dot(x, params["lin_w"], precision=hi) + params["lin_b"]
    return y, jnp.stack(finals, axis=0)


# ----------------------------- main -----------------------------
if __name__ == "__main__":
    root = jax.random.PRNGKey(0)
    k_tok, k_par = jax.random.split(root)

    tokens = jax.random.randint(k_tok, (BATCH, SEQ), 0, VOCAB_SZ, dtype=jnp.int32)
    params = init_params(k_par)
    packed = pack_params(params)

    fwd = jax.jit(lambda tok: predictor_forward(packed, tok))
    y, state = fwd(tokens)
    jax.block_until_ready((y, state))

    # warm-start path (as used by decode_greedy / transcribe_stream)
    fwd_ws = jax.jit(lambda tok, st: predictor_forward(packed, tok, state=st))
    y2, state2 = fwd_ws(tokens, state)
    jax.block_until_ready((y2, state2))

    assert y.shape == (BATCH, SEQ, OUT_SZ), y.shape
    assert state.shape == (NUM_LAYERS, BATCH, HIDDEN_SZ), state.shape
    assert bool(jnp.all(jnp.isfinite(y)) & jnp.all(jnp.isfinite(state)))
    assert bool(jnp.all(jnp.isfinite(y2)) & jnp.all(jnp.isfinite(state2)))

    # Kernel MXU math is bf16 (weights stored bf16; TPU default-precision matmuls
    # truncate operands to bf16 anyway) while the reference runs Precision.HIGHEST,
    # so tolerances cover the bf16-class error across the 8-step recurrence.
    y_ref, state_ref = predictor_reference(params, tokens)
    y2_ref, state2_ref = predictor_reference(params, tokens, state=state_ref)
    assert bool(jnp.allclose(y, y_ref, atol=5e-2, rtol=5e-2))
    assert bool(jnp.allclose(state, state_ref, atol=5e-2, rtol=5e-2))
    assert bool(jnp.allclose(y2, y2_ref, atol=5e-2, rtol=5e-2))
    assert bool(jnp.allclose(state2, state2_ref, atol=5e-2, rtol=5e-2))

    print("KERNEL_OK")
</pallas_src>

<mosaic_0001>
module attributes {stable_mosaic.version = 11 : i64} {
  func.func @kernel(%arg0: memref<64x1xi32, #tpu.memory_space<vmem>>, %arg1: memref<2x8x64xf32, #tpu.memory_space<vmem>>, %arg2: memref<128x192xbf16, #tpu.memory_space<vmem>>, %arg3: memref<64x128xbf16, #tpu.memory_space<vmem>>, %arg4: memref<128x192xbf16, #tpu.memory_space<vmem>>, %arg5: memref<1x192xf32, #tpu.memory_space<vmem>>, %arg6: memref<64x128xbf16, #tpu.memory_space<vmem>>, %arg7: memref<1x128xf32, #tpu.memory_space<vmem>>, %arg8: memref<8x8x128xf32, #tpu.memory_space<vmem>>, %arg9: memref<2x8x64xf32, #tpu.memory_space<vmem>>, %arg10: memref<64x192xf32, #tpu.memory_space<vmem>>) attributes {dimension_semantics = [], scalar_prefetch = 0 : i64, scratch_operands = 1 : i64, tpu.core_type = #tpu.core_type<tc>} {
    %0 = tpu.iota {dimensions = array<i32: 1>} : vector<64x128xi32>
    %c0 = arith.constant 0 : index
    %c0_0 = arith.constant 0 : index
    %1 = vector.load %arg0[%c0, %c0_0] : memref<64x1xi32, #tpu.memory_space<vmem>>, vector<64x1xi32>
    %2 = vector.broadcast %1 : vector<64x1xi32> to vector<64x128xi32>
    %3 = arith.cmpi eq, %0, %2 : vector<64x128xi32>
    %cst = arith.constant 1.000000e+00 : f32
    %cst_1 = arith.constant 0.000000e+00 : f32
    %4 = vector.broadcast %cst : f32 to vector<64x128xf32>
    %5 = vector.broadcast %cst_1 : f32 to vector<64x128xf32>
    %6 = arith.select %3, %4, %5 : vector<64x128xi1>, vector<64x128xf32>
    %7 = arith.truncf %6 : vector<64x128xf32> to vector<64x128xbf16>
    %c0_2 = arith.constant 0 : index
    %c0_3 = arith.constant 0 : index
    %8 = vector.load %arg2[%c0_2, %c0_3] : memref<128x192xbf16, #tpu.memory_space<vmem>>, vector<128x192xbf16>
    %cst_4 = arith.constant dense<0.000000e+00> : vector<64x192xf32>
    %9 = tpu.matmul %7, %8, %cst_4 {dimension_numbers = #tpu.dot_dimension_numbers<[1], [0], [0], [1], [0, 0, 1, 1], [], []>} : vector<64x128xbf16>, vector<128x192xbf16>, vector<64x192xf32> -> vector<64x192xf32>
    %c0_5 = arith.constant 0 : index
    %c0_6 = arith.constant 0 : index
    %10 = vector.load %arg10[%c0_5, %c0_6] : memref<64x192xf32, #tpu.memory_space<vmem>>, vector<64x192xf32>
    tpu.vector_store %arg10[%c0_5, %c0_6], %9 {strides = array<i32>} : memref<64x192xf32, #tpu.memory_space<vmem>>, vector<64x192xf32>,
    %c0_7 = arith.constant 0 : index
    %c0_8 = arith.constant 0 : index
    %11 = vector.load %arg3[%c0_7, %c0_8] : memref<64x128xbf16, #tpu.memory_space<vmem>>, vector<64x128xbf16>
    %c0_9 = arith.constant 0 : index
    %c0_10 = arith.constant 0 : index
    %12 = vector.load %arg4[%c0_9, %c0_10] : memref<128x192xbf16, #tpu.memory_space<vmem>>, vector<128x192xbf16>
    %c0_11 = arith.constant 0 : index
    %c0_12 = arith.constant 0 : index
    %13 = vector.load %arg5[%c0_11, %c0_12] : memref<1x192xf32, #tpu.memory_space<vmem>>, vector<1x192xf32>
    %14 = vector.shape_cast %13 : vector<1x192xf32> to vector<1x192xf32>
    %15 = vector.broadcast %14 : vector<1x192xf32> to vector<8x192xf32>
    %c0_13 = arith.constant 0 : index
    %c0_14 = arith.constant 0 : index
    %c0_15 = arith.constant 0 : index
    %16 = vector.load %arg1[%c0_13, %c0_14, %c0_15] : memref<2x8x64xf32, #tpu.memory_space<vmem>>, vector<1x8x64xf32>
    %17 = vector.shape_cast %16 : vector<1x8x64xf32> to vector<8x64xf32>
    %c1 = arith.constant 1 : index
    %c0_16 = arith.constant 0 : index
    %c0_17 = arith.constant 0 : index
    %18 = vector.load %arg1[%c1, %c0_16, %c0_17] : memref<2x8x64xf32, #tpu.memory_space<vmem>>, vector<1x8x64xf32>
    %19 = vector.shape_cast %18 : vector<1x8x64xf32> to vector<8x64xf32>
    %c0_18 = arith.constant 0 : index
    %c0_19 = arith.constant 0 : index
    %20 = vector.load %arg10[%c0_18, %c0_19] : memref<64x192xf32, #tpu.memory_space<vmem>>, vector<8x192xf32>
    %21 = arith.truncf %17 : vector<8x64xf32> to vector<8x64xbf16>
    %cst_20 = arith.constant dense<0.000000e+00> : vector<8x128xf32>
    %22 = tpu.matmul %21, %11, %cst_20 {dimension_numbers = #tpu.dot_dimension_numbers<[1], [0], [0], [1], [0, 0, 1, 1], [], []>} : vector<8x64xbf16>, vector<64x128xbf16>, vector<8x128xf32> -> vector<8x128xf32>
    %23 = vector.extract_strided_slice %20 {offsets = [0, 0], sizes = [8, 64], strides = [1, 1]} : vector<8x192xf32> to vector<8x64xf32>
    %24 = vector.extract_strided_slice %22 {offsets = [0, 0], sizes = [8, 64], strides = [1, 1]} : vector<8x128xf32> to vector<8x64xf32>
    %25 = arith.addf %23, %24 : vector<8x64xf32>
    %26 = math.tanh %25 : vector<8x64xf32>
    %cst_21 = arith.constant 1.000000e+00 : f32
    %27 = vector.broadcast %cst_21 : f32 to vector<8x64xf32>
    %28 = arith.addf %27, %26 : vector<8x64xf32>
    %29 = vector.extract_strided_slice %20 {offsets = [0, 64], sizes = [8, 64], strides = [1, 1]} : vector<8x192xf32> to vector<8x64xf32>
    %30 = vector.extract_strided_slice %22 {offsets = [0, 64], sizes = [8, 64], strides = [1, 1]} : vector<8x128xf32> to vector<8x64xf32>
    %31 = arith.addf %29, %30 : vector<8x64xf32>
    %cst_22 = arith.constant 5.000000e-01 : f32
    %32 = vector.broadcast %cst_22 : f32 to vector<8x64xf32>
    %33 = arith.mulf %32, %31 : vector<8x64xf32>
    %34 = math.tanh %33 : vector<8x64xf32>
    %cst_23 = arith.constant 1.000000e+00 : f32
    %35 = vector.broadcast %cst_23 : f32 to vector<8x64xf32>
    %36 = arith.addf %35, %34 : vector<8x64xf32>
    %cst_24 = arith.constant 5.000000e-01 : f32
    %37 = vector.broadcast %cst_24 : f32 to vector<8x64xf32>
    %38 = arith.mulf %37, %36 : vector<8x64xf32>
    %39 = vector.extract_strided_slice %20 {offsets = [0, 128], sizes = [8, 64], strides = [1, 1]} : vector<8x192xf32> to vector<8x64xf32>
    %40 = arith.mulf %28, %17 : vector<8x64xf32>
    %41 = arith.addf %39, %40 : vector<8x64xf32>
    %42 = math.tanh %41 : vector<8x64xf32>
    %cst_25 = arith.constant 1.000000e+00 : f32
    %43 = vector.broadcast %cst_25 : f32 to vector<8x64xf32>
    %44 = arith.subf %43, %38 : vector<8x64xf32>
    %45 = arith.subf %42, %17 : vector<8x64xf32>
    %46 = arith.mulf %44, %45 : vector<8x64xf32>
    %47 = arith.addf %17, %46 : vector<8x64xf32>
    %48 = tpu.concatenate %47, %19 in 1 : vector<8x64xf32>, vector<8x64xf32> -> vector<8x128xf32>
    %49 = arith.truncf %48 : vector<8x128xf32> to vector<8x128xbf16>
    %cst_26 = arith.constant dense<0.000000e+00> : vector<8x192xf32>
    %50 = tpu.matmul %49, %12, %cst_26 {dimension_numbers = #tpu.dot_dimension_numbers<[1], [0], [0], [1], [0, 0, 1, 1], [], []>} : vector<8x128xbf16>, vector<128x192xbf16>, vector<8x192xf32> -> vector<8x192xf32>
    %51 = arith.addf %50, %15 : vector<8x192xf32>
    %52 = vector.extract_strided_slice %51 {offsets = [0, 0], sizes = [8, 64], strides = [1, 1]} : vector<8x192xf32> to vector<8x64xf32>
    %53 = math.tanh %52 : vector<8x64xf32>
    %cst_27 = arith.constant 1.000000e+00 : f32
    %54 = vector.broadcast %cst_27 : f32 to vector<8x64xf32>
    %55 = arith.addf %54, %53 : vector<8x64xf32>
    %56 = vector.extract_strided_slice %51 {offsets = [0, 64], sizes = [8, 64], strides = [1, 1]} : vector<8x192xf32> to vector<8x64xf32>
    %cst_28 = arith.constant 5.000000e-01 : f32
    %57 = vector.broadcast %cst_28 : f32 to vector<8x64xf32>
    %58 = arith.mulf %57, %56 : vector<8x64xf32>
    %59 = math.tanh %58 : vector<8x64xf32>
    %cst_29 = arith.constant 1.000000e+00 : f32
    %60 = vector.broadcast %cst_29 : f32 to vector<8x64xf32>
    %61 = arith.addf %60, %59 : vector<8x64xf32>
    %cst_30 = arith.constant 5.000000e-01 : f32
    %62 = vector.broadcast %cst_30 : f32 to vector<8x64xf32>
    %63 = arith.mulf %62, %61 : vector<8x64xf32>
    %64 = vector.extract_strided_slice %51 {offsets = [0, 128], sizes = [8, 64], strides = [1, 1]} : vector<8x192xf32> to vector<8x64xf32>
    %65 = arith.mulf %55, %19 : vector<8x64xf32>
    %66 = arith.addf %64, %65 : vector<8x64xf32>
    %67 = math.tanh %66 : vector<8x64xf32>
    %cst_31 = arith.constant 1.000000e+00 : f32
    %68 = vector.broadcast %cst_31 : f32 to vector<8x64xf32>
    %69 = arith.subf %68, %63 : vector<8x64xf32>
    %70 = arith.subf %67, %19 : vector<8x64xf32>
    %71 = arith.mulf %69, %70 : vector<8x64xf32>
    %72 = arith.addf %19, %71 : vector<8x64xf32>
    %c8 = arith.constant 8 : index
    %c0_32 = arith.constant 0 : index
    %73 = vector.load %arg10[%c8, %c0_32] : memref<64x192xf32, #tpu.memory_space<vmem>>, vector<8x192xf32>
    %74 = arith.truncf %47 : vector<8x64xf32> to vector<8x64xbf16>
    %cst_33 = arith.constant dense<0.000000e+00> : vector<8x128xf32>
    %75 = tpu.matmul %74, %11, %cst_33 {dimension_numbers = #tpu.dot_dimension_numbers<[1], [0], [0], [1], [0, 0, 1, 1], [], []>} : vector<8x64xbf16>, vector<64x128xbf16>, vector<8x128xf32> -> vector<8x128xf32>
    %76 = vector.extract_strided_slice %73 {offsets = [0, 0], sizes = [8, 64], strides = [1, 1]} : vector<8x192xf32> to vector<8x64xf32>
    %77 = vector.extract_strided_slice %75 {offsets = [0, 0], sizes = [8, 64], strides = [1, 1]} : vector<8x128xf32> to vector<8x64xf32>
    %78 = arith.addf %76, %77 : vector<8x64xf32>
    %79 = math.tanh %78 : vector<8x64xf32>
    %cst_34 = arith.constant 1.000000e+00 : f32
    %80 = vector.broadcast %cst_34 : f32 to vector<8x64xf32>
    %81 = arith.addf %80, %79 : vector<8x64xf32>
    %82 = vector.extract_strided_slice %73 {offsets = [0, 64], sizes = [8, 64], strides = [1, 1]} : vector<8x192xf32> to vector<8x64xf32>
    %83 = vector.extract_strided_slice %75 {offsets = [0, 64], sizes = [8, 64], strides = [1, 1]} : vector<8x128xf32> to vector<8x64xf32>
    %84 = arith.addf %82, %83 : vector<8x64xf32>
    %cst_35 = arith.constant 5.000000e-01 : f32
    %85 = vector.broadcast %cst_35 : f32 to vector<8x64xf32>
    %86 = arith.mulf %85, %84 : vector<8x64xf32>
    %87 = math.tanh %86 : vector<8x64xf32>
    %cst_36 = arith.constant 1.000000e+00 : f32
    %88 = vector.broadcast %cst_36 : f32 to vector<8x64xf32>
    %89 = arith.addf %88, %87 : vector<8x64xf32>
    %cst_37 = arith.constant 5.000000e-01 : f32
    %90 = vector.broadcast %cst_37 : f32 to vector<8x64xf32>
    %91 = arith.mulf %90, %89 : vector<8x64xf32>
    %92 = vector.extract_strided_slice %73 {offsets = [0, 128], sizes = [8, 64], strides = [1, 1]} : vector<8x192xf32> to vector<8x64xf32>
    %93 = arith.mulf %81, %47 : vector<8x64xf32>
    %94 = arith.addf %92, %93 : vector<8x64xf32>
    %95 = math.tanh %94 : vector<8x64xf32>
    %cst_38 = arith.constant 1.000000e+00 : f32
    %96 = vector.broadcast %cst_38 : f32 to vector<8x64xf32>
    %97 = arith.subf %96, %91 : vector<8x64xf32>
    %98 = arith.subf %95, %47 : vector<8x64xf32>
    %99 = arith.mulf %97, %98 : vector<8x64xf32>
    %100 = arith.addf %47, %99 : vector<8x64xf32>
    %101 = tpu.concatenate %100, %72 in 1 : vector<8x64xf32>, vector<8x64xf32> -> vector<8x128xf32>
    %102 = arith.truncf %101 : vector<8x128xf32> to vector<8x128xbf16>
    %cst_39 = arith.constant dense<0.000000e+00> : vector<8x192xf32>
    %103 = tpu.matmul %102, %12, %cst_39 {dimension_numbers = #tpu.dot_dimension_numbers<[1], [0], [0], [1], [0, 0, 1, 1], [], []>} : vector<8x128xbf16>, vector<128x192xbf16>, vector<8x192xf32> -> vector<8x192xf32>
    %104 = arith.addf %103, %15 : vector<8x192xf32>
    %105 = vector.extract_strided_slice %104 {offsets = [0, 0], sizes = [8, 64], strides = [1, 1]} : vector<8x192xf32> to vector<8x64xf32>
    %106 = math.tanh %105 : vector<8x64xf32>
    %cst_40 = arith.constant 1.000000e+00 : f32
    %107 = vector.broadcast %cst_40 : f32 to vector<8x64xf32>
    %108 = arith.addf %107, %106 : vector<8x64xf32>
    %109 = vector.extract_strided_slice %104 {offsets = [0, 64], sizes = [8, 64], strides = [1, 1]} : vector<8x192xf32> to vector<8x64xf32>
    %cst_41 = arith.constant 5.000000e-01 : f32
    %110 = vector.broadcast %cst_41 : f32 to vector<8x64xf32>
    %111 = arith.mulf %110, %109 : vector<8x64xf32>
    %112 = math.tanh %111 : vector<8x64xf32>
    %cst_42 = arith.constant 1.000000e+00 : f32
    %113 = vector.broadcast %cst_42 : f32 to vector<8x64xf32>
    %114 = arith.addf %113, %112 : vector<8x64xf32>
    %cst_43 = arith.constant 5.000000e-01 : f32
    %115 = vector.broadcast %cst_43 : f32 to vector<8x64xf32>
    %116 = arith.mulf %115, %114 : vector<8x64xf32>
    %117 = vector.extract_strided_slice %104 {offsets = [0, 128], sizes = [8, 64], strides = [1, 1]} : vector<8x192xf32> to vector<8x64xf32>
    %118 = arith.mulf %108, %72 : vector<8x64xf32>
    %119 = arith.addf %117, %118 : vector<8x64xf32>
    %120 = math.tanh %119 : vector<8x64xf32>
    %cst_44 = arith.constant 1.000000e+00 : f32
    %121 = vector.broadcast %cst_44 : f32 to vector<8x64xf32>
    %122 = arith.subf %121, %116 : vector<8x64xf32>
    %123 = arith.subf %120, %72 : vector<8x64xf32>
    %124 = arith.mulf %122, %123 : vector<8x64xf32>
    %125 = arith.addf %72, %124 : vector<8x64xf32>
    %c16 = arith.constant 16 : index
    %c0_45 = arith.constant 0 : index
    %126 = vector.load %arg10[%c16, %c0_45] : memref<64x192xf32, #tpu.memory_space<vmem>>, vector<8x192xf32>
    %127 = arith.truncf %100 : vector<8x64xf32> to vector<8x64xbf16>
    %cst_46 = arith.constant dense<0.000000e+00> : vector<8x128xf32>
    %128 = tpu.matmul %127, %11, %cst_46 {dimension_numbers = #tpu.dot_dimension_numbers<[1], [0], [0], [1], [0, 0, 1, 1], [], []>} : vector<8x64xbf16>, vector<64x128xbf16>, vector<8x128xf32> -> vector<8x128xf32>
    %129 = vector.extract_strided_slice %126 {offsets = [0, 0], sizes = [8, 64], strides = [1, 1]} : vector<8x192xf32> to vector<8x64xf32>
    %130 = vector.extract_strided_slice %128 {offsets = [0, 0], sizes = [8, 64], strides = [1, 1]} : vector<8x128xf32> to vector<8x64xf32>
    %131 = arith.addf %129, %130 : vector<8x64xf32>
    %132 = math.tanh %131 : vector<8x64xf32>
    %cst_47 = arith.constant 1.000000e+00 : f32
    %133 = vector.broadcast %cst_47 : f32 to vector<8x64xf32>
    %134 = arith.addf %133, %132 : vector<8x64xf32>
    %135 = vector.extract_strided_slice %126 {offsets = [0, 64], sizes = [8, 64], strides = [1, 1]} : vector<8x192xf32> to vector<8x64xf32>
    %136 = vector.extract_strided_slice %128 {offsets = [0, 64], sizes = [8, 64], strides = [1, 1]} : vector<8x128xf32> to vector<8x64xf32>
    %137 = arith.addf %135, %136 : vector<8x64xf32>
    %cst_48 = arith.constant 5.000000e-01 : f32
    %138 = vector.broadcast %cst_48 : f32 to vector<8x64xf32>
    %139 = arith.mulf %138, %137 : vector<8x64xf32>
    %140 = math.tanh %139 : vector<8x64xf32>
    %cst_49 = arith.constant 1.000000e+00 : f32
    %141 = vector.broadcast %cst_49 : f32 to vector<8x64xf32>
    %142 = arith.addf %141, %140 : vector<8x64xf32>
    %cst_50 = arith.constant 5.000000e-01 : f32
    %143 = vector.broadcast %cst_50 : f32 to vector<8x64xf32>
    %144 = arith.mulf %143, %142 : vector<8x64xf32>
    %145 = vector.extract_strided_slice %126 {offsets = [0, 128], sizes = [8, 64], strides = [1, 1]} : vector<8x192xf32> to vector<8x64xf32>
    %146 = arith.mulf %134, %100 : vector<8x64xf32>
    %147 = arith.addf %145, %146 : vector<8x64xf32>
    %148 = math.tanh %147 : vector<8x64xf32>
    %cst_51 = arith.constant 1.000000e+00 : f32
    %149 = vector.broadcast %cst_51 : f32 to vector<8x64xf32>
    %150 = arith.subf %149, %144 : vector<8x64xf32>
    %151 = arith.subf %148, %100 : vector<8x64xf32>
    %152 = arith.mulf %150, %151 : vector<8x64xf32>
    %153 = arith.addf %100, %152 : vector<8x64xf32>
    %154 = tpu.concatenate %153, %125 in 1 : vector<8x64xf32>, vector<8x64xf32> -> vector<8x128xf32>
    %155 = arith.truncf %154 : vector<8x128xf32> to vector<8x128xbf16>
    %cst_52 = arith.constant dense<0.000000e+00> : vector<8x192xf32>
    %156 = tpu.matmul %155, %12, %cst_52 {dimension_numbers = #tpu.dot_dimension_numbers<[1], [0], [0], [1], [0, 0, 1, 1], [], []>} : vector<8x128xbf16>, vector<128x192xbf16>, vector<8x192xf32> -> vector<8x192xf32>
    %157 = arith.addf %156, %15 : vector<8x192xf32>
    %158 = vector.extract_strided_slice %157 {offsets = [0, 0], sizes = [8, 64], strides = [1, 1]} : vector<8x192xf32> to vector<8x64xf32>
    %159 = math.tanh %158 : vector<8x64xf32>
    %cst_53 = arith.constant 1.000000e+00 : f32
    %160 = vector.broadcast %cst_53 : f32 to vector<8x64xf32>
    %161 = arith.addf %160, %159 : vector<8x64xf32>
    %162 = vector.extract_strided_slice %157 {offsets = [0, 64], sizes = [8, 64], strides = [1, 1]} : vector<8x192xf32> to vector<8x64xf32>
    %cst_54 = arith.constant 5.000000e-01 : f32
    %163 = vector.broadcast %cst_54 : f32 to vector<8x64xf32>
    %164 = arith.mulf %163, %162 : vector<8x64xf32>
    %165 = math.tanh %164 : vector<8x64xf32>
    %cst_55 = arith.constant 1.000000e+00 : f32
    %166 = vector.broadcast %cst_55 : f32 to vector<8x64xf32>
    %167 = arith.addf %166, %165 : vector<8x64xf32>
    %cst_56 = arith.constant 5.000000e-01 : f32
    %168 = vector.broadcast %cst_56 : f32 to vector<8x64xf32>
    %169 = arith.mulf %168, %167 : vector<8x64xf32>
    %170 = vector.extract_strided_slice %157 {offsets = [0, 128], sizes = [8, 64], strides = [1, 1]} : vector<8x192xf32> to vector<8x64xf32>
    %171 = arith.mulf %161, %125 : vector<8x64xf32>
    %172 = arith.addf %170, %171 : vector<8x64xf32>
    %173 = math.tanh %172 : vector<8x64xf32>
    %cst_57 = arith.constant 1.000000e+00 : f32
    %174 = vector.broadcast %cst_57 : f32 to vector<8x64xf32>
    %175 = arith.subf %174, %169 : vector<8x64xf32>
    %176 = arith.subf %173, %125 : vector<8x64xf32>
    %177 = arith.mulf %175, %176 : vector<8x64xf32>
    %178 = arith.addf %125, %177 : vector<8x64xf32>
    %c24 = arith.constant 24 : index
    %c0_58 = arith.constant 0 : index
    %179 = vector.load %arg10[%c24, %c0_58] : memref<64x192xf32, #tpu.memory_space<vmem>>, vector<8x192xf32>
    %180 = arith.truncf %153 : vector<8x64xf32> to vector<8x64xbf16>
    %cst_59 = arith.constant dense<0.000000e+00> : vector<8x128xf32>
    %181 = tpu.matmul %180, %11, %cst_59 {dimension_numbers = #tpu.dot_dimension_numbers<[1], [0], [0], [1], [0, 0, 1, 1], [], []>} : vector<8x64xbf16>, vector<64x128xbf16>, vector<8x128xf32> -> vector<8x128xf32>
    %182 = vector.extract_strided_slice %179 {offsets = [0, 0], sizes = [8, 64], strides = [1, 1]} : vector<8x192xf32> to vector<8x64xf32>
    %183 = vector.extract_strided_slice %181 {offsets = [0, 0], sizes = [8, 64], strides = [1, 1]} : vector<8x128xf32> to vector<8x64xf32>
    %184 = arith.addf %182, %183 : vector<8x64xf32>
    %185 = math.tanh %184 : vector<8x64xf32>
    %cst_60 = arith.constant 1.000000e+00 : f32
    %186 = vector.broadcast %cst_60 : f32 to vector<8x64xf32>
    %187 = arith.addf %186, %185 : vector<8x64xf32>
    %188 = vector.extract_strided_slice %179 {offsets = [0, 64], sizes = [8, 64], strides = [1, 1]} : vector<8x192xf32> to vector<8x64xf32>
    %189 = vector.extract_strided_slice %181 {offsets = [0, 64], sizes = [8, 64], strides = [1, 1]} : vector<8x128xf32> to vector<8x64xf32>
    %190 = arith.addf %188, %189 : vector<8x64xf32>
    %cst_61 = arith.constant 5.000000e-01 : f32
    %191 = vector.broadcast %cst_61 : f32 to vector<8x64xf32>
    %192 = arith.mulf %191, %190 : vector<8x64xf32>
    %193 = math.tanh %192 : vector<8x64xf32>
    %cst_62 = arith.constant 1.000000e+00 : f32
    %194 = vector.broadcast %cst_62 : f32 to vector<8x64xf32>
    %195 = arith.addf %194, %193 : vector<8x64xf32>
    %cst_63 = arith.constant 5.000000e-01 : f32
    %196 = vector.broadcast %cst_63 : f32 to vector<8x64xf32>
    %197 = arith.mulf %196, %195 : vector<8x64xf32>
    %198 = vector.extract_strided_slice %179 {offsets = [0, 128], sizes = [8, 64], strides = [1, 1]} : vector<8x192xf32> to vector<8x64xf32>
    %199 = arith.mulf %187, %153 : vector<8x64xf32>
    %200 = arith.addf %198, %199 : vector<8x64xf32>
    %201 = math.tanh %200 : vector<8x64xf32>
    %cst_64 = arith.constant 1.000000e+00 : f32
    %202 = vector.broadcast %cst_64 : f32 to vector<8x64xf32>
    %203 = arith.subf %202, %197 : vector<8x64xf32>
    %204 = arith.subf %201, %153 : vector<8x64xf32>
    %205 = arith.mulf %203, %204 : vector<8x64xf32>
    %206 = arith.addf %153, %205 : vector<8x64xf32>
    %207 = tpu.concatenate %206, %178 in 1 : vector<8x64xf32>, vector<8x64xf32> -> vector<8x128xf32>
    %208 = arith.truncf %207 : vector<8x128xf32> to vector<8x128xbf16>
    %cst_65 = arith.constant dense<0.000000e+00> : vector<8x192xf32>
    %209 = tpu.matmul %208, %12, %cst_65 {dimension_numbers = #tpu.dot_dimension_numbers<[1], [0], [0], [1], [0, 0, 1, 1], [], []>} : vector<8x128xbf16>, vector<128x192xbf16>, vector<8x192xf32> -> vector<8x192xf32>
    %210 = arith.addf %209, %15 : vector<8x192xf32>
    %211 = vector.extract_strided_slice %210 {offsets = [0, 0], sizes = [8, 64], strides = [1, 1]} : vector<8x192xf32> to vector<8x64xf32>
    %212 = math.tanh %211 : vector<8x64xf32>
    %cst_66 = arith.constant 1.000000e+00 : f32
    %213 = vector.broadcast %cst_66 : f32 to vector<8x64xf32>
    %214 = arith.addf %213, %212 : vector<8x64xf32>
    %215 = vector.extract_strided_slice %210 {offsets = [0, 64], sizes = [8, 64], strides = [1, 1]} : vector<8x192xf32> to vector<8x64xf32>
    %cst_67 = arith.constant 5.000000e-01 : f32
    %216 = vector.broadcast %cst_67 : f32 to vector<8x64xf32>
    %217 = arith.mulf %216, %215 : vector<8x64xf32>
    %218 = math.tanh %217 : vector<8x64xf32>
    %cst_68 = arith.constant 1.000000e+00 : f32
    %219 = vector.broadcast %cst_68 : f32 to vector<8x64xf32>
    %220 = arith.addf %219, %218 : vector<8x64xf32>
    %cst_69 = arith.constant 5.000000e-01 : f32
    %221 = vector.broadcast %cst_69 : f32 to vector<8x64xf32>
    %222 = arith.mulf %221, %220 : vector<8x64xf32>
    %223 = vector.extract_strided_slice %210 {offsets = [0, 128], sizes = [8, 64], strides = [1, 1]} : vector<8x192xf32> to vector<8x64xf32>
    %224 = arith.mulf %214, %178 : vector<8x64xf32>
    %225 = arith.addf %223, %224 : vector<8x64xf32>
    %226 = math.tanh %225 : vector<8x64xf32>
    %cst_70 = arith.constant 1.000000e+00 : f32
    %227 = vector.broadcast %cst_70 : f32 to vector<8x64xf32>
    %228 = arith.subf %227, %222 : vector<8x64xf32>
    %229 = arith.subf %226, %178 : vector<8x64xf32>
    %230 = arith.mulf %228, %229 : vector<8x64xf32>
    %231 = arith.addf %178, %230 : vector<8x64xf32>
    %c32 = arith.constant 32 : index
    %c0_71 = arith.constant 0 : index
    %232 = vector.load %arg10[%c32, %c0_71] : memref<64x192xf32, #tpu.memory_space<vmem>>, vector<8x192xf32>
    %233 = arith.truncf %206 : vector<8x64xf32> to vector<8x64xbf16>
    %cst_72 = arith.constant dense<0.000000e+00> : vector<8x128xf32>
    %234 = tpu.matmul %233, %11, %cst_72 {dimension_numbers = #tpu.dot_dimension_numbers<[1], [0], [0], [1], [0, 0, 1, 1], [], []>} : vector<8x64xbf16>, vector<64x128xbf16>, vector<8x128xf32> -> vector<8x128xf32>
    %235 = vector.extract_strided_slice %232 {offsets = [0, 0], sizes = [8, 64], strides = [1, 1]} : vector<8x192xf32> to vector<8x64xf32>
    %236 = vector.extract_strided_slice %234 {offsets = [0, 0], sizes = [8, 64], strides = [1, 1]} : vector<8x128xf32> to vector<8x64xf32>
    %237 = arith.addf %235, %236 : vector<8x64xf32>
    %238 = math.tanh %237 : vector<8x64xf32>
    %cst_73 = arith.constant 1.000000e+00 : f32
    %239 = vector.broadcast %cst_73 : f32 to vector<8x64xf32>
    %240 = arith.addf %239, %238 : vector<8x64xf32>
    %241 = vector.extract_strided_slice %232 {offsets = [0, 64], sizes = [8, 64], strides = [1, 1]} : vector<8x192xf32> to vector<8x64xf32>
    %242 = vector.extract_strided_slice %234 {offsets = [0, 64], sizes = [8, 64], strides = [1, 1]} : vector<8x128xf32> to vector<8x64xf32>
    %243 = arith.addf %241, %242 : vector<8x64xf32>
    %cst_74 = arith.constant 5.000000e-01 : f32
    %244 = vector.broadcast %cst_74 : f32 to vector<8x64xf32>
    %245 = arith.mulf %244, %243 : vector<8x64xf32>
    %246 = math.tanh %245 : vector<8x64xf32>
    %cst_75 = arith.constant 1.000000e+00 : f32
    %247 = vector.broadcast %cst_75 : f32 to vector<8x64xf32>
    %248 = arith.addf %247, %246 : vector<8x64xf32>
    %cst_76 = arith.constant 5.000000e-01 : f32
    %249 = vector.broadcast %cst_76 : f32 to vector<8x64xf32>
    %250 = arith.mulf %249, %248 : vector<8x64xf32>
    %251 = vector.extract_strided_slice %232 {offsets = [0, 128], sizes = [8, 64], strides = [1, 1]} : vector<8x192xf32> to vector<8x64xf32>
    %252 = arith.mulf %240, %206 : vector<8x64xf32>
    %253 = arith.addf %251, %252 : vector<8x64xf32>
    %254 = math.tanh %253 : vector<8x64xf32>
    %cst_77 = arith.constant 1.000000e+00 : f32
    %255 = vector.broadcast %cst_77 : f32 to vector<8x64xf32>
    %256 = arith.subf %255, %250 : vector<8x64xf32>
    %257 = arith.subf %254, %206 : vector<8x64xf32>
    %258 = arith.mulf %256, %257 : vector<8x64xf32>
    %259 = arith.addf %206, %258 : vector<8x64xf32>
    %260 = tpu.concatenate %259, %231 in 1 : vector<8x64xf32>, vector<8x64xf32> -> vector<8x128xf32>
    %261 = arith.truncf %260 : vector<8x128xf32> to vector<8x128xbf16>
    %cst_78 = arith.constant dense<0.000000e+00> : vector<8x192xf32>
    %262 = tpu.matmul %261, %12, %cst_78 {dimension_numbers = #tpu.dot_dimension_numbers<[1], [0], [0], [1], [0, 0, 1, 1], [], []>} : vector<8x128xbf16>, vector<128x192xbf16>, vector<8x192xf32> -> vector<8x192xf32>
    %263 = arith.addf %262, %15 : vector<8x192xf32>
    %264 = vector.extract_strided_slice %263 {offsets = [0, 0], sizes = [8, 64], strides = [1, 1]} : vector<8x192xf32> to vector<8x64xf32>
    %265 = math.tanh %264 : vector<8x64xf32>
    %cst_79 = arith.constant 1.000000e+00 : f32
    %266 = vector.broadcast %cst_79 : f32 to vector<8x64xf32>
    %267 = arith.addf %266, %265 : vector<8x64xf32>
    %268 = vector.extract_strided_slice %263 {offsets = [0, 64], sizes = [8, 64], strides = [1, 1]} : vector<8x192xf32> to vector<8x64xf32>
    %cst_80 = arith.constant 5.000000e-01 : f32
    %269 = vector.broadcast %cst_80 : f32 to vector<8x64xf32>
    %270 = arith.mulf %269, %268 : vector<8x64xf32>
    %271 = math.tanh %270 : vector<8x64xf32>
    %cst_81 = arith.constant 1.000000e+00 : f32
    %272 = vector.broadcast %cst_81 : f32 to vector<8x64xf32>
    %273 = arith.addf %272, %271 : vector<8x64xf32>
    %cst_82 = arith.constant 5.000000e-01 : f32
    %274 = vector.broadcast %cst_82 : f32 to vector<8x64xf32>
    %275 = arith.mulf %274, %273 : vector<8x64xf32>
    %276 = vector.extract_strided_slice %263 {offsets = [0, 128], sizes = [8, 64], strides = [1, 1]} : vector<8x192xf32> to vector<8x64xf32>
    %277 = arith.mulf %267, %231 : vector<8x64xf32>
    %278 = arith.addf %276, %277 : vector<8x64xf32>
    %279 = math.tanh %278 : vector<8x64xf32>
    %cst_83 = arith.constant 1.000000e+00 : f32
    %280 = vector.broadcast %cst_83 : f32 to vector<8x64xf32>
    %281 = arith.subf %280, %275 : vector<8x64xf32>
    %282 = arith.subf %279, %231 : vector<8x64xf32>
    %283 = arith.mulf %281, %282 : vector<8x64xf32>
    %284 = arith.addf %231, %283 : vector<8x64xf32>
    %c40 = arith.constant 40 : index
    %c0_84 = arith.constant 0 : index
    %285 = vector.load %arg10[%c40, %c0_84] : memref<64x192xf32, #tpu.memory_space<vmem>>, vector<8x192xf32>
    %286 = arith.truncf %259 : vector<8x64xf32> to vector<8x64xbf16>
    %cst_85 = arith.constant dense<0.000000e+00> : vector<8x128xf32>
    %287 = tpu.matmul %286, %11, %cst_85 {dimension_numbers = #tpu.dot_dimension_numbers<[1], [0], [0], [1], [0, 0, 1, 1], [], []>} : vector<8x64xbf16>, vector<64x128xbf16>, vector<8x128xf32> -> vector<8x128xf32>
    %288 = vector.extract_strided_slice %285 {offsets = [0, 0], sizes = [8, 64], strides = [1, 1]} : vector<8x192xf32> to vector<8x64xf32>
    %289 = vector.extract_strided_slice %287 {offsets = [0, 0], sizes = [8, 64], strides = [1, 1]} : vector<8x128xf32> to vector<8x64xf32>
    %290 = arith.addf %288, %289 : vector<8x64xf32>
    %291 = math.tanh %290 : vector<8x64xf32>
    %cst_86 = arith.constant 1.000000e+00 : f32
    %292 = vector.broadcast %cst_86 : f32 to vector<8x64xf32>
    %293 = arith.addf %292, %291 : vector<8x64xf32>
    %294 = vector.extract_strided_slice %285 {offsets = [0, 64], sizes = [8, 64], strides = [1, 1]} : vector<8x192xf32> to vector<8x64xf32>
    %295 = vector.extract_strided_slice %287 {offsets = [0, 64], sizes = [8, 64], strides = [1, 1]} : vector<8x128xf32> to vector<8x64xf32>
    %296 = arith.addf %294, %295 : vector<8x64xf32>
    %cst_87 = arith.constant 5.000000e-01 : f32
    %297 = vector.broadcast %cst_87 : f32 to vector<8x64xf32>
    %298 = arith.mulf %297, %296 : vector<8x64xf32>
    %299 = math.tanh %298 : vector<8x64xf32>
    %cst_88 = arith.constant 1.000000e+00 : f32
    %300 = vector.broadcast %cst_88 : f32 to vector<8x64xf32>
    %301 = arith.addf %300, %299 : vector<8x64xf32>
    %cst_89 = arith.constant 5.000000e-01 : f32
    %302 = vector.broadcast %cst_89 : f32 to vector<8x64xf32>
    %303 = arith.mulf %302, %301 : vector<8x64xf32>
    %304 = vector.extract_strided_slice %285 {offsets = [0, 128], sizes = [8, 64], strides = [1, 1]} : vector<8x192xf32> to vector<8x64xf32>
    %305 = arith.mulf %293, %259 : vector<8x64xf32>
    %306 = arith.addf %304, %305 : vector<8x64xf32>
    %307 = math.tanh %306 : vector<8x64xf32>
    %cst_90 = arith.constant 1.000000e+00 : f32
    %308 = vector.broadcast %cst_90 : f32 to vector<8x64xf32>
    %309 = arith.subf %308, %303 : vector<8x64xf32>
    %310 = arith.subf %307, %259 : vector<8x64xf32>
    %311 = arith.mulf %309, %310 : vector<8x64xf32>
    %312 = arith.addf %259, %311 : vector<8x64xf32>
    %313 = tpu.concatenate %312, %284 in 1 : vector<8x64xf32>, vector<8x64xf32> -> vector<8x128xf32>
    %314 = arith.truncf %313 : vector<8x128xf32> to vector<8x128xbf16>
    %cst_91 = arith.constant dense<0.000000e+00> : vector<8x192xf32>
    %315 = tpu.matmul %314, %12, %cst_91 {dimension_numbers = #tpu.dot_dimension_numbers<[1], [0], [0], [1], [0, 0, 1, 1], [], []>} : vector<8x128xbf16>, vector<128x192xbf16>, vector<8x192xf32> -> vector<8x192xf32>
    %316 = arith.addf %315, %15 : vector<8x192xf32>
    %317 = vector.extract_strided_slice %316 {offsets = [0, 0], sizes = [8, 64], strides = [1, 1]} : vector<8x192xf32> to vector<8x64xf32>
    %318 = math.tanh %317 : vector<8x64xf32>
    %cst_92 = arith.constant 1.000000e+00 : f32
    %319 = vector.broadcast %cst_92 : f32 to vector<8x64xf32>
    %320 = arith.addf %319, %318 : vector<8x64xf32>
    %321 = vector.extract_strided_slice %316 {offsets = [0, 64], sizes = [8, 64], strides = [1, 1]} : vector<8x192xf32> to vector<8x64xf32>
    %cst_93 = arith.constant 5.000000e-01 : f32
    %322 = vector.broadcast %cst_93 : f32 to vector<8x64xf32>
    %323 = arith.mulf %322, %321 : vector<8x64xf32>
    %324 = math.tanh %323 : vector<8x64xf32>
    %cst_94 = arith.constant 1.000000e+00 : f32
    %325 = vector.broadcast %cst_94 : f32 to vector<8x64xf32>
    %326 = arith.addf %325, %324 : vector<8x64xf32>
    %cst_95 = arith.constant 5.000000e-01 : f32
    %327 = vector.broadcast %cst_95 : f32 to vector<8x64xf32>
    %328 = arith.mulf %327, %326 : vector<8x64xf32>
    %329 = vector.extract_strided_slice %316 {offsets = [0, 128], sizes = [8, 64], strides = [1, 1]} : vector<8x192xf32> to vector<8x64xf32>
    %330 = arith.mulf %320, %284 : vector<8x64xf32>
    %331 = arith.addf %329, %330 : vector<8x64xf32>
    %332 = math.tanh %331 : vector<8x64xf32>
    %cst_96 = arith.constant 1.000000e+00 : f32
    %333 = vector.broadcast %cst_96 : f32 to vector<8x64xf32>
    %334 = arith.subf %333, %328 : vector<8x64xf32>
    %335 = arith.subf %332, %284 : vector<8x64xf32>
    %336 = arith.mulf %334, %335 : vector<8x64xf32>
    %337 = arith.addf %284, %336 : vector<8x64xf32>
    %c48 = arith.constant 48 : index
    %c0_97 = arith.constant 0 : index
    %338 = vector.load %arg10[%c48, %c0_97] : memref<64x192xf32, #tpu.memory_space<vmem>>, vector<8x192xf32>
    %339 = arith.truncf %312 : vector<8x64xf32> to vector<8x64xbf16>
    %cst_98 = arith.constant dense<0.000000e+00> : vector<8x128xf32>
    %340 = tpu.matmul %339, %11, %cst_98 {dimension_numbers = #tpu.dot_dimension_numbers<[1], [0], [0], [1], [0, 0, 1, 1], [], []>} : vector<8x64xbf16>, vector<64x128xbf16>, vector<8x128xf32> -> vector<8x128xf32>
    %341 = vector.extract_strided_slice %338 {offsets = [0, 0], sizes = [8, 64], strides = [1, 1]} : vector<8x192xf32> to vector<8x64xf32>
    %342 = vector.extract_strided_slice %340 {offsets = [0, 0], sizes = [8, 64], strides = [1, 1]} : vector<8x128xf32> to vector<8x64xf32>
    %343 = arith.addf %341, %342 : vector<8x64xf32>
    %344 = math.tanh %343 : vector<8x64xf32>
    %cst_99 = arith.constant 1.000000e+00 : f32
    %345 = vector.broadcast %cst_99 : f32 to vector<8x64xf32>
    %346 = arith.addf %345, %344 : vector<8x64xf32>
    %347 = vector.extract_strided_slice %338 {offsets = [0, 64], sizes = [8, 64], strides = [1, 1]} : vector<8x192xf32> to vector<8x64xf32>
    %348 = vector.extract_strided_slice %340 {offsets = [0, 64], sizes = [8, 64], strides = [1, 1]} : vector<8x128xf32> to vector<8x64xf32>
    %349 = arith.addf %347, %348 : vector<8x64xf32>
    %cst_100 = arith.constant 5.000000e-01 : f32
    %350 = vector.broadcast %cst_100 : f32 to vector<8x64xf32>
    %351 = arith.mulf %350, %349 : vector<8x64xf32>
    %352 = math.tanh %351 : vector<8x64xf32>
    %cst_101 = arith.constant 1.000000e+00 : f32
    %353 = vector.broadcast %cst_101 : f32 to vector<8x64xf32>
    %354 = arith.addf %353, %352 : vector<8x64xf32>
    %cst_102 = arith.constant 5.000000e-01 : f32
    %355 = vector.broadcast %cst_102 : f32 to vector<8x64xf32>
    %356 = arith.mulf %355, %354 : vector<8x64xf32>
    %357 = vector.extract_strided_slice %338 {offsets = [0, 128], sizes = [8, 64], strides = [1, 1]} : vector<8x192xf32> to vector<8x64xf32>
    %358 = arith.mulf %346, %312 : vector<8x64xf32>
    %359 = arith.addf %357, %358 : vector<8x64xf32>
    %360 = math.tanh %359 : vector<8x64xf32>
    %cst_103 = arith.constant 1.000000e+00 : f32
    %361 = vector.broadcast %cst_103 : f32 to vector<8x64xf32>
    %362 = arith.subf %361, %356 : vector<8x64xf32>
    %363 = arith.subf %360, %312 : vector<8x64xf32>
    %364 = arith.mulf %362, %363 : vector<8x64xf32>
    %365 = arith.addf %312, %364 : vector<8x64xf32>
    %366 = tpu.concatenate %365, %337 in 1 : vector<8x64xf32>, vector<8x64xf32> -> vector<8x128xf32>
    %367 = arith.truncf %366 : vector<8x128xf32> to vector<8x128xbf16>
    %cst_104 = arith.constant dense<0.000000e+00> : vector<8x192xf32>
    %368 = tpu.matmul %367, %12, %cst_104 {dimension_numbers = #tpu.dot_dimension_numbers<[1], [0], [0], [1], [0, 0, 1, 1], [], []>} : vector<8x128xbf16>, vector<128x192xbf16>, vector<8x192xf32> -> vector<8x192xf32>
    %369 = arith.addf %368, %15 : vector<8x192xf32>
    %370 = vector.extract_strided_slice %369 {offsets = [0, 0], sizes = [8, 64], strides = [1, 1]} : vector<8x192xf32> to vector<8x64xf32>
    %371 = math.tanh %370 : vector<8x64xf32>
    %cst_105 = arith.constant 1.000000e+00 : f32
    %372 = vector.broadcast %cst_105 : f32 to vector<8x64xf32>
    %373 = arith.addf %372, %371 : vector<8x64xf32>
    %374 = vector.extract_strided_slice %369 {offsets = [0, 64], sizes = [8, 64], strides = [1, 1]} : vector<8x192xf32> to vector<8x64xf32>
    %cst_106 = arith.constant 5.000000e-01 : f32
    %375 = vector.broadcast %cst_106 : f32 to vector<8x64xf32>
    %376 = arith.mulf %375, %374 : vector<8x64xf32>
    %377 = math.tanh %376 : vector<8x64xf32>
    %cst_107 = arith.constant 1.000000e+00 : f32
    %378 = vector.broadcast %cst_107 : f32 to vector<8x64xf32>
    %379 = arith.addf %378, %377 : vector<8x64xf32>
    %cst_108 = arith.constant 5.000000e-01 : f32
    %380 = vector.broadcast %cst_108 : f32 to vector<8x64xf32>
    %381 = arith.mulf %380, %379 : vector<8x64xf32>
    %382 = vector.extract_strided_slice %369 {offsets = [0, 128], sizes = [8, 64], strides = [1, 1]} : vector<8x192xf32> to vector<8x64xf32>
    %383 = arith.mulf %373, %337 : vector<8x64xf32>
    %384 = arith.addf %382, %383 : vector<8x64xf32>
    %385 = math.tanh %384 : vector<8x64xf32>
    %cst_109 = arith.constant 1.000000e+00 : f32
    %386 = vector.broadcast %cst_109 : f32 to vector<8x64xf32>
    %387 = arith.subf %386, %381 : vector<8x64xf32>
    %388 = arith.subf %385, %337 : vector<8x64xf32>
    %389 = arith.mulf %387, %388 : vector<8x64xf32>
    %390 = arith.addf %337, %389 : vector<8x64xf32>
    %c56 = arith.constant 56 : index
    %c0_110 = arith.constant 0 : index
    %391 = vector.load %arg10[%c56, %c0_110] : memref<64x192xf32, #tpu.memory_space<vmem>>, vector<8x192xf32>
    %392 = arith.truncf %365 : vector<8x64xf32> to vector<8x64xbf16>
    %cst_111 = arith.constant dense<0.000000e+00> : vector<8x128xf32>
    %393 = tpu.matmul %392, %11, %cst_111 {dimension_numbers = #tpu.dot_dimension_numbers<[1], [0], [0], [1], [0, 0, 1, 1], [], []>} : vector<8x64xbf16>, vector<64x128xbf16>, vector<8x128xf32> -> vector<8x128xf32>
    %394 = vector.extract_strided_slice %391 {offsets = [0, 0], sizes = [8, 64], strides = [1, 1]} : vector<8x192xf32> to vector<8x64xf32>
    %395 = vector.extract_strided_slice %393 {offsets = [0, 0], sizes = [8, 64], strides = [1, 1]} : vector<8x128xf32> to vector<8x64xf32>
    %396 = arith.addf %394, %395 : vector<8x64xf32>
    %397 = math.tanh %396 : vector<8x64xf32>
    %cst_112 = arith.constant 1.000000e+00 : f32
    %398 = vector.broadcast %cst_112 : f32 to vector<8x64xf32>
    %399 = arith.addf %398, %397 : vector<8x64xf32>
    %400 = vector.extract_strided_slice %391 {offsets = [0, 64], sizes = [8, 64], strides = [1, 1]} : vector<8x192xf32> to vector<8x64xf32>
    %401 = vector.extract_strided_slice %393 {offsets = [0, 64], sizes = [8, 64], strides = [1, 1]} : vector<8x128xf32> to vector<8x64xf32>
    %402 = arith.addf %400, %401 : vector<8x64xf32>
    %cst_113 = arith.constant 5.000000e-01 : f32
    %403 = vector.broadcast %cst_113 : f32 to vector<8x64xf32>
    %404 = arith.mulf %403, %402 : vector<8x64xf32>
    %405 = math.tanh %404 : vector<8x64xf32>
    %cst_114 = arith.constant 1.000000e+00 : f32
    %406 = vector.broadcast %cst_114 : f32 to vector<8x64xf32>
    %407 = arith.addf %406, %405 : vector<8x64xf32>
    %cst_115 = arith.constant 5.000000e-01 : f32
    %408 = vector.broadcast %cst_115 : f32 to vector<8x64xf32>
    %409 = arith.mulf %408, %407 : vector<8x64xf32>
    %410 = vector.extract_strided_slice %391 {offsets = [0, 128], sizes = [8, 64], strides = [1, 1]} : vector<8x192xf32> to vector<8x64xf32>
    %411 = arith.mulf %399, %365 : vector<8x64xf32>
    %412 = arith.addf %410, %411 : vector<8x64xf32>
    %413 = math.tanh %412 : vector<8x64xf32>
    %cst_116 = arith.constant 1.000000e+00 : f32
    %414 = vector.broadcast %cst_116 : f32 to vector<8x64xf32>
    %415 = arith.subf %414, %409 : vector<8x64xf32>
    %416 = arith.subf %413, %365 : vector<8x64xf32>
    %417 = arith.mulf %415, %416 : vector<8x64xf32>
    %418 = arith.addf %365, %417 : vector<8x64xf32>
    %419 = tpu.concatenate %418, %390 in 1 : vector<8x64xf32>, vector<8x64xf32> -> vector<8x128xf32>
    %420 = arith.truncf %419 : vector<8x128xf32> to vector<8x128xbf16>
    %cst_117 = arith.constant dense<0.000000e+00> : vector<8x192xf32>
    %421 = tpu.matmul %420, %12, %cst_117 {dimension_numbers = #tpu.dot_dimension_numbers<[1], [0], [0], [1], [0, 0, 1, 1], [], []>} : vector<8x128xbf16>, vector<128x192xbf16>, vector<8x192xf32> -> vector<8x192xf32>
    %422 = arith.addf %421, %15 : vector<8x192xf32>
    %423 = vector.extract_strided_slice %422 {offsets = [0, 0], sizes = [8, 64], strides = [1, 1]} : vector<8x192xf32> to vector<8x64xf32>
    %424 = math.tanh %423 : vector<8x64xf32>
    %cst_118 = arith.constant 1.000000e+00 : f32
    %425 = vector.broadcast %cst_118 : f32 to vector<8x64xf32>
    %426 = arith.addf %425, %424 : vector<8x64xf32>
    %427 = vector.extract_strided_slice %422 {offsets = [0, 64], sizes = [8, 64], strides = [1, 1]} : vector<8x192xf32> to vector<8x64xf32>
    %cst_119 = arith.constant 5.000000e-01 : f32
    %428 = vector.broadcast %cst_119 : f32 to vector<8x64xf32>
    %429 = arith.mulf %428, %427 : vector<8x64xf32>
    %430 = math.tanh %429 : vector<8x64xf32>
    %cst_120 = arith.constant 1.000000e+00 : f32
    %431 = vector.broadcast %cst_120 : f32 to vector<8x64xf32>
    %432 = arith.addf %431, %430 : vector<8x64xf32>
    %cst_121 = arith.constant 5.000000e-01 : f32
    %433 = vector.broadcast %cst_121 : f32 to vector<8x64xf32>
    %434 = arith.mulf %433, %432 : vector<8x64xf32>
    %435 = vector.extract_strided_slice %422 {offsets = [0, 128], sizes = [8, 64], strides = [1, 1]} : vector<8x192xf32> to vector<8x64xf32>
    %436 = arith.mulf %426, %390 : vector<8x64xf32>
    %437 = arith.addf %435, %436 : vector<8x64xf32>
    %438 = math.tanh %437 : vector<8x64xf32>
    %cst_122 = arith.constant 1.000000e+00 : f32
    %439 = vector.broadcast %cst_122 : f32 to vector<8x64xf32>
    %440 = arith.subf %439, %434 : vector<8x64xf32>
    %441 = arith.subf %438, %390 : vector<8x64xf32>
    %442 = arith.mulf %440, %441 : vector<8x64xf32>
    %443 = arith.addf %390, %442 : vector<8x64xf32>
    %444 = tpu.concatenate %72, %125, %178, %231, %284, %337, %390, %443 in 0 : vector<8x64xf32>, vector<8x64xf32>, vector<8x64xf32>, vector<8x64xf32>, vector<8x64xf32>, vector<8x64xf32>, vector<8x64xf32>, vector<8x64xf32> -> vector<64x64xf32>
    %445 = arith.truncf %444 : vector<64x64xf32> to vector<64x64xbf16>
    %c0_123 = arith.constant 0 : index
    %c0_124 = arith.constant 0 : index
    %446 = vector.load %arg6[%c0_123, %c0_124] : memref<64x128xbf16, #tpu.memory_space<vmem>>, vector<64x128xbf16>
    %cst_125 = arith.constant dense<0.000000e+00> : vector<64x128xf32>
    %447 = tpu.matmul %445, %446, %cst_125 {dimension_numbers = #tpu.dot_dimension_numbers<[1], [0], [0], [1], [0, 0, 1, 1], [], []>} : vector<64x64xbf16>, vector<64x128xbf16>, vector<64x128xf32> -> vector<64x128xf32>
    %c0_126 = arith.constant 0 : index
    %c0_127 = arith.constant 0 : index
    %448 = vector.load %arg7[%c0_126, %c0_127] : memref<1x128xf32, #tpu.memory_space<vmem>>, vector<1x128xf32>
    %449 = vector.broadcast %448 : vector<1x128xf32> to vector<64x128xf32>
    %450 = arith.addf %447, %449 : vector<64x128xf32>
    %451 = vector.shape_cast %450 : vector<64x128xf32> to vector<8x8x128xf32>
    %c0_128 = arith.constant 0 : index
    %c0_129 = arith.constant 0 : index
    %c0_130 = arith.constant 0 : index
    %452 = vector.load %arg8[%c0_128, %c0_129, %c0_130] : memref<8x8x128xf32, #tpu.memory_space<vmem>>, vector<8x8x128xf32>
    tpu.vector_store %arg8[%c0_128, %c0_129, %c0_130], %451 {strides = array<i32>} : memref<8x8x128xf32, #tpu.memory_space<vmem>>, vector<8x8x128xf32>,
    %c0_131 = arith.constant 0 : index
    %c0_132 = arith.constant 0 : index
    %c0_133 = arith.constant 0 : index
    %453 = vector.load %arg9[%c0_131, %c0_132, %c0_133] : memref<2x8x64xf32, #tpu.memory_space<vmem>>, vector<1x8x64xf32>
    %454 = vector.shape_cast %453 : vector<1x8x64xf32> to vector<8x64xf32>
    %455 = vector.shape_cast %418 : vector<8x64xf32> to vector<1x8x64xf32>
    tpu.vector_store %arg9[%c0_131, %c0_132, %c0_133], %455 {strides = array<i32>} : memref<2x8x64xf32, #tpu.memory_space<vmem>>, vector<1x8x64xf32>,
    %c1_134 = arith.constant 1 : index
    %c0_135 = arith.constant 0 : index
    %c0_136 = arith.constant 0 : index
    %456 = vector.load %arg9[%c1_134, %c0_135, %c0_136] : memref<2x8x64xf32, #tpu.memory_space<vmem>>, vector<1x8x64xf32>
    %457 = vector.shape_cast %456 : vector<1x8x64xf32> to vector<8x64xf32>
    %458 = vector.shape_cast %443 : vector<8x64xf32> to vector<1x8x64xf32>
    tpu.vector_store %arg9[%c1_134, %c0_135, %c0_136], %458 {strides = array<i32>} : memref<2x8x64xf32, #tpu.memory_space<vmem>>, vector<1x8x64xf32>,
    return
  }
}

</mosaic_0001>

<bundles_post_ra>
// kernel: _lambda_.1
= control target key start
LH: loop header
LB: loop body
LE: loop exit
PB: predicated region body
PF: predicated region fallthrough
CT: control target
= control target key end

     0   :  { %15 = vsyncpa [#allocation4], 0  ;;  %s2284_s0 = inlined_call_operand.vmem [shape: s32[64,1], index: 0, kind: input, shape index: {}]   ;;  %s2285_s1 = inlined_call_operand.vmem [shape: f32[2,8,64], index: 1, kind: input, shape index: {}]   ;;  %s2286_s2 = inlined_call_operand.hbm [shape: bf16[128,192], index: 2, kind: input, shape index: {}]   ;;  %s2287_s3 = inlined_call_operand.vmem [shape: bf16[64,128], index: 3, kind: input, shape index: {}]   ;;  %s2288_s4 = inlined_call_operand.hbm [shape: bf16[128,192], index: 4, kind: input, shape index: {}]   ;;  %s2289_s5 = inlined_call_operand.vmem [shape: f32[1,192], index: 5, kind: input, shape index: {}]   ;;  %s2290_s6 = inlined_call_operand.vmem [shape: bf16[64,128], index: 6, kind: input, shape index: {}]   ;;  %s2291_s7 = inlined_call_operand.vmem [shape: f32[1,128], index: 7, kind: input, shape index: {}]   ;;  %s2292_s8 = inlined_call_operand.vmem [shape: f32[8,8,128], index: 8, kind: output, shape index: {0}]   ;;  %s2293_s9 = inlined_call_operand.vmem [shape: f32[2,8,64], index: 9, kind: output, shape index: {1}]  }
   0x1   :  { %s25_s11 = sshll.u32 %s2286_s2, 4  ;;  %s26_s11 = int_to_ptr.hbm [resolvable:$true] %s25_s11 }
   0x2   :  { %16 = vsyncpa [#allocation6], 0  ;;  %s1673_s12 = smov [#allocation3]   ;;  %s40_s16 = sshll.u32 %s2288_s4, 4  ;;  %s41_s16 = int_to_ptr.hbm [resolvable:$true] %s40_s16 }
   0x3   :  { %s27_s13 = sshll.u32 %s1673_s12, 4  ;;  %s1674_s17 = smov 128   ;;  %s28_s13 = int_to_ptr.vmem [resolvable:$true] %s27_s13 }
   0x4   :  { %s1675_s18 = smov 8   ;;  %s1676_s19 = smov [#allocation5]  }
   0x5   :  { %33 = dma.hbm_to_vmem [thread:$0]  %s26_s11, 2048, %s28_s13, [#allocation4], %s1674_s17, %s1674_s17, %s1675_s18  }
   0x6   :  { %s42_s20 = sshll.u32 %s1676_s19, 4  ;;  %s43_s20 = int_to_ptr.vmem [resolvable:$true] %s42_s20 }
   0x7   :  { %48 = dma.hbm_to_vmem [thread:$0]  %s41_s16, 2048, %s43_s20, [#allocation6], %s1674_s17, %s1674_s17, %s1675_s18  }
   0x8   :  { %1669 = dma.done.wait [#allocation4], 2048  }
   0x9   :  { %1670 = vsyncadd [#allocation4], 4294965248 }
   0xa   :  { %1671 = dma.done.wait [#allocation6], 2048  }
   0xb   :  { %1672 = vsyncadd [#allocation6], 4294965248  ;;  %v1677_v0 = vmov 0   ;;  %v66_v1 = vld [vmem:[%s2284_s0] sm:$0xff]  ;;  %v1338_v2 = vld [vmem:[#allocation3 + $0x70] sm:$0xf]  ;;  %v64_v60 = vlaneseq }
   0xc   :  { %1517 = vset.pattern.permute.xlu0 %v1677_v0  ;;  %1518 = vset.pattern.permute.xlu1 %v1677_v0  ;;  %v1485_v3 = vld [vmem:[#allocation3 + $0x74] sm:$0xf0]  ;;  %v1484_v4 = vld [vmem:[#allocation3 + $0x74] sm:$0xf]  ;;  %v1340_v6 = vld [vmem:[#allocation3 + $0x78] sm:$0xf0] }
   0xd   :  { %1519 = vset.pattern.permute.xlu2 %v1677_v0  ;;  %75 = vperm.xlu0 %1517, %v66_v1   ;;  %v1339_v5 = vor.u32 %v1485_v3, %v1338_v2  ;;  %v1330_v7 = vld [vmem:[#allocation3 + $0x60] sm:$0xf]  ;;  %v1483_v8 = vld [vmem:[#allocation3 + $0x64] sm:$0xf0]  ;;  %v1343_v9 = vor.u32 %v1484_v4, %v1340_v6  ;;  %v1482_v10 = vld [vmem:[#allocation3 + $0x64] sm:$0xf] }
   0xe   :  { %v1332_v11 = vld [vmem:[#allocation3 + $0x68] sm:$0xf0]  ;;  %v1331_v12 = vor.u32 %v1483_v8, %v1330_v7  ;;  %v1322_v14 = vld [vmem:[#allocation3 + $0x50] sm:$0xf]  ;;  %v1481_v15 = vld [vmem:[#allocation3 + $0x54] sm:$0xf0] }
   0xf   :  { %214 = vmatpush.bf16.msra.mxu0 %v1339_v5  ;;  %243 = vmatpush.bf16.msra.mxu1 %v1343_v9  ;;  %v1335_v13 = vor.u32 %v1482_v10, %v1332_v11  ;;  %v1742_v16 = vld [vmem:[%s2287_s3 + $0x18] sm:$0xff]  ;;  %v67_v17 = vld [vmem:[%s2284_s0 + $0x8] sm:$0xff]  ;;  %v1480_v18 = vld [vmem:[#allocation3 + $0x54] sm:$0xf]  ;;  %v1323_v21 = vor.u32 %v1481_v15, %v1322_v14  ;;  %vm273_vm0 = vcmask 523264   ;;  %v1788_v61 = vand.u32 127, %v64_v60 }
  0x10   :  { %v1324_v19 = vld [vmem:[#allocation3 + $0x58] sm:$0xf0]  ;;  %356 = vmatpush.bf16.msra.mxu2 %v1742_v16  ;;  %v1751_v20 = vld [vmem:[%s2287_s3 + $0x10] sm:$0xff]  ;;  %530 = vmatpush.bf16.msra.mxu3 %v1742_v16  ;;  %v1314_v23 = vld [vmem:[#allocation3 + $0x40] sm:$0xf]  ;;  %s1679_s20 = smov 64  }
  0x11   :  { %v1327_v22 = vor.u32 %v1480_v18, %v1324_v19  ;;  %v1479_v24 = vld [vmem:[#allocation3 + $0x44] sm:$0xf0]  ;;  %v1478_v25 = vld [vmem:[#allocation3 + $0x44] sm:$0xf]  ;;  %v1316_v26 = vld [vmem:[#allocation3 + $0x48] sm:$0xf0] }
  0x12   :  { %v1758_v27 = vld [vmem:[%s2287_s3 + $0x8] sm:$0xff]  ;;  %v1315_v28 = vor.u32 %v1479_v24, %v1314_v23  ;;  %v1319_v29 = vor.u32 %v1478_v25, %v1316_v26  ;;  %v1306_v30 = vld [vmem:[#allocation3 + $0x30] sm:$0xf]  ;;  %v1477_v31 = vld [vmem:[#allocation3 + $0x34] sm:$0xf0] }
  0x13   :  { %215 = vmatpush.bf16.msra.mxu0 %v1331_v12  ;;  %244 = vmatpush.bf16.msra.mxu1 %v1335_v13  ;;  %v71_v32 = vld [vmem:[%s2284_s0 + $0x28] sm:$0xff]  ;;  %v1476_v33 = vld [vmem:[#allocation3 + $0x34] sm:$0xf]  ;;  %v1308_v34 = vld [vmem:[#allocation3 + $0x38] sm:$0xf0]  ;;  %v1307_v35 = vor.u32 %v1477_v31, %v1306_v30 }
  0x14   :  { %357 = vmatpush.bf16.msra.mxu2 %v1751_v20  ;;  %531 = vmatpush.bf16.msra.mxu3 %v1751_v20  ;;  %v1311_v36 = vor.u32 %v1476_v33, %v1308_v34  ;;  %v1298_v37 = vld [vmem:[#allocation3 + $0x20] sm:$0xf]  ;;  %v1475_v38 = vld [vmem:[#allocation3 + $0x24] sm:$0xf0]  ;;  %v1474_v39 = vld [vmem:[#allocation3 + $0x24] sm:$0xf] }
  0x15   :  { %78 = vperm.xlu0 %1517, %v67_v17   ;;  %v1300_v40 = vld [vmem:[#allocation3 + $0x28] sm:$0xf0]  ;;  %v1299_v41 = vor.u32 %v1475_v38, %v1298_v37  ;;  %v1769_v43 = vld [vmem:[%s2287_s3] sm:$0xff]  ;;  %v1290_v46 = vld [vmem:[#allocation3 + $0x10] sm:$0xf] }
  0x16   :  { %v1303_v42 = vor.u32 %v1474_v39, %v1300_v40  ;;  %v1775_v44 = vld [vmem:[%s2285_s1] sm:$0xff]  ;;  %v1473_v47 = vld [vmem:[#allocation3 + $0x14] sm:$0xf0]  ;;  %v1472_v48 = vld [vmem:[#allocation3 + $0x14] sm:$0xf] }
  0x17   :  { %216 = vmatpush.bf16.msra.mxu0 %v1323_v21  ;;  %245 = vmatpush.bf16.msra.mxu1 %v1327_v22  ;;  %v324_v45 = vpack.c.bf16 %v1775_v44, %v1775_v44  ;;  %v1291_v49 = vor.u32 %v1473_v47, %v1290_v46  ;;  %v1292_v50 = vld [vmem:[#allocation3 + $0x18] sm:$0xf0]  ;;  %v1282_v51 = vld [vmem:[#allocation3] sm:$0xf]  ;;  %v1471_v52 = vld [vmem:[#allocation3 + $0x4] sm:$0xf0] }
  0x18   :  { %358 = vmatpush.bf16.msra.mxu2 %v1758_v27  ;;  %532 = vmatpush.bf16.msra.mxu3 %v1758_v27  ;;  %v1295_v53 = vor.u32 %v1472_v48, %v1292_v50  ;;  %v1470_v54 = vld [vmem:[#allocation3 + $0x4] sm:$0xf]  ;;  %v1284_v55 = vld [vmem:[#allocation3 + $0x8] sm:$0xf0]  ;;  %v1283_v56 = vor.u32 %v1471_v52, %v1282_v51  ;;  %v68_v58 = vld [vmem:[%s2284_s0 + $0x10] sm:$0xff] }
  0x19   :  { %v1287_v57 = vor.u32 %v1470_v54, %v1284_v55  ;;  %81 = vperm.xlu1 %1518, %v68_v58   ;;  %v1678_v63 = vmov 1.0|1.0   ;;  %v69_v1 = vld [vmem:[%s2284_s0 + $0x18] sm:$0xff]  ;;  %v72_v6 = vld [vmem:[%s2284_s0 + $0x30] sm:$0xff]  ;;  %v70_v17 = vld [vmem:[%s2284_s0 + $0x20] sm:$0xff] }
  0x1a   :  { %v73_v18 = vld [vmem:[%s2284_s0 + $0x38] sm:$0xff]  ;;  %v1820_v22 = vld [vmem:[%s2285_s1 + $0x8] sm:$0xff]  ;;  %v1428_v30 = vld [vmem:[#allocation5 + $0x60] sm:$0xf] }
  0x1b   :  { %217 = vmatpush.bf16.msra.mxu0 %v1315_v28  ;;  %246 = vmatpush.bf16.msra.mxu1 %v1319_v29  ;;  %v1436_v28 = vld [vmem:[#allocation5 + $0x70] sm:$0xf]  ;;  %v1505_v29 = vld [vmem:[#allocation5 + $0x74] sm:$0xf0]  ;;  %v1438_v37 = vld [vmem:[#allocation5 + $0x78] sm:$0xf0] }
  0x1c   :  { %359 = vmatpush.bf16.msra.mxu2 %v1769_v43  ;;  %533 = vmatpush.bf16.msra.mxu3 %v1769_v43  ;;  %v1824_v31 = vor.u32 %v1505_v29, %v1436_v28  ;;  %v1501_v38 = vld [vmem:[#allocation5 + $0x54] sm:$0xf0]  ;;  %v1502_v40 = vld [vmem:[#allocation5 + $0x64] sm:$0xf]  ;;  %v1500_v48 = vld [vmem:[#allocation5 + $0x54] sm:$0xf] }
  0x1d   :  { %90 = vperm.xlu0 %1517, %v71_v32   ;;  %v1503_v32 = vld [vmem:[#allocation5 + $0x64] sm:$0xf0]  ;;  %v1412_v50 = vld [vmem:[#allocation5 + $0x40] sm:$0xf]  ;;  %v1498_v55 = vld [vmem:[#allocation5 + $0x44] sm:$0xf] }
  0x1e   :  { %v1827_v34 = vor.u32 %v1503_v32, %v1428_v30  ;;  %v1499_v51 = vld [vmem:[#allocation5 + $0x44] sm:$0xf0]  ;;  %v1497_v58 = vld [vmem:[#allocation5 + $0x34] sm:$0xf0] }
  0x1f   :  { %218 = vmatpush.bf16.msra.mxu0 %v1307_v35  ;;  %247 = vmatpush.bf16.msra.mxu1 %v1311_v36  ;;  %v1420_v35 = vld [vmem:[#allocation5 + $0x50] sm:$0xf]  ;;  %v1504_v36 = vld [vmem:[#allocation5 + $0x74] sm:$0xf]  ;;  %v1846_v54 = vor.u32 %v1499_v51, %v1412_v50  ;;  %v313_v50 = vld [vmem:[%s2289_s5] sm:$0x3] }
  0x20   :  { %1377 = vmatmul.msk.bf16.vlgmr.msra.gmra.mxu2 %vm273_vm0, %v324_v45  ;;  %v1830_v39 = vor.u32 %v1504_v36, %v1438_v37  ;;  %v1837_v47 = vor.u32 %v1501_v38, %v1420_v35  ;;  %v1962_v51 = vperm.slane %v313_v50, 0 }
  0x21   :  { %84 = vperm.xlu1 %1518, %v69_v1   ;;  %v1406_v1 = vld [vmem:[#allocation5 + $0x38] sm:$0xf0] }
  0x22   :  { %486 = vmatpush.bf16.msrb.mxu2 %v1830_v39  ;;  %580 = vmatpush.bf16.msrb.mxu3 %v1830_v39 }
  0x23   :  { %219 = vmatpush.bf16.msra.mxu0 %v1299_v41  ;;  %248 = vmatpush.bf16.msra.mxu1 %v1303_v42  ;;  %v1430_v41 = vld [vmem:[#allocation5 + $0x68] sm:$0xf0] }
  0x24   :  { %v1833_v46 = vor.u32 %v1502_v40, %v1430_v41 }
  0x26   :  { %487 = vmatpush.bf16.msrb.mxu2 %v1833_v46  ;;  %581 = vmatpush.bf16.msrb.mxu3 %v1833_v46 }
  0x27   :  { %220 = vmatpush.bf16.msra.mxu0 %v1291_v49  ;;  %249 = vmatpush.bf16.msra.mxu1 %v1295_v53  ;;  %v1422_v49 = vld [vmem:[#allocation5 + $0x58] sm:$0xf0] }
  0x28   :  { %v1842_v52 = vor.u32 %v1500_v48, %v1422_v49 }
  0x29   :  { %93 = vperm.xlu1 %1518, %v72_v6   ;;  %v1494_v6 = vld [vmem:[#allocation5 + $0x24] sm:$0xf] }
  0x2a   :  { %488 = vmatpush.bf16.msrb.mxu2 %v1842_v52  ;;  %582 = vmatpush.bf16.msrb.mxu3 %v1842_v52 }
  0x2b   :  { %221 = vmatpush.bf16.msra.mxu0 %v1283_v56  ;;  %250 = vmatpush.bf16.msra.mxu1 %v1287_v57  ;;  %v1414_v56 = vld [vmem:[#allocation5 + $0x48] sm:$0xf0]  ;;  %v1404_v57 = vld [vmem:[#allocation5 + $0x30] sm:$0xf] }
  0x2c   :  { %v1852_v60 = vor.u32 %v1498_v55, %v1414_v56 }
  0x2e   :  { %489 = vmatpush.bf16.msrb.mxu2 %v1852_v60  ;;  %583 = vmatpush.bf16.msrb.mxu3 %v1852_v60 }
  0x2f   :  { %624 = vmatpush.bf16.msrb.mxu0 %v1742_v16  ;;  %473 = vmatpush.bf16.msrb.mxu1 %v1824_v31 }
  0x31   :  { %388 = vrot.lane.b32.xlu1 %v1820_v22, %s1679_s20 }
  0x33   :  { %625 = vmatpush.bf16.msrb.mxu0 %v1751_v20  ;;  %474 = vmatpush.bf16.msrb.mxu1 %v1827_v34 }
  0x37   :  { %626 = vmatpush.bf16.msrb.mxu0 %v1758_v27  ;;  %475 = vmatpush.bf16.msrb.mxu1 %v1837_v47 }
  0x3b   :  { %627 = vmatpush.bf16.msrb.mxu0 %v1769_v43  ;;  %476 = vmatpush.bf16.msrb.mxu1 %v1846_v54 }
  0x7f   :  { %v76_v59 = vpop.permute.xlu0 %75 }
  0x80   :  { %vm98_vm1 = vcmp.eq.s32.totalorder %v1788_v61, %v76_v59 }
  0x87   :  { %v79_v62 = vpop.permute.xlu0 %78 }
  0x88   :  { %vm99_vm2 = vcmp.eq.s32.totalorder %v1788_v61, %v79_v62  ;;  %v1856_v62 = vor.u32 %v1497_v58, %v1404_v57 }
  0x89   :  { %vm1344_vm3 = vmpackc.low %vm99_vm2, %vm98_vm1 }
  0x8a   :  { %1345 = vmatmul.msk.bf16.vlgmr.msra.gmra.mxu0 %vm1344_vm3, %v1678_v63  ;;  %1353 = vmatmul.msk.bf16.vlgmr.msra.gmra.mxu1 %vm1344_vm3, %v1678_v63 }
  0x8b   :  { %v82_v19 = vpop.permute.xlu1 %81  ;;  %755 = vmatpush.bf16.msra.mxu0 %v1824_v31  ;;  %477 = vmatpush.bf16.msrb.mxu1 %v1856_v62 }
  0x8c   :  { %vm100_vm4 = vcmp.eq.s32.totalorder %v1788_v61, %v82_v19  ;;  %v1491_v19 = vld [vmem:[#allocation5 + $0x4] sm:$0xf0] }
  0x8f   :  { %756 = vmatpush.bf16.msra.mxu0 %v1827_v34  ;;  %v91_v53 = vpop.permute.xlu0 %90 }
  0x90   :  { %vm103_vm7 = vcmp.eq.s32.totalorder %v1788_v61, %v91_v53 }
  0x93   :  { %v85_v21 = vpop.permute.xlu1 %84  ;;  %757 = vmatpush.bf16.msra.mxu0 %v1837_v47 }
  0x94   :  { %vm101_vm5 = vcmp.eq.s32.totalorder %v1788_v61, %v85_v21 }
  0x95   :  { %vm1346_vm6 = vmpackc.low %vm101_vm5, %vm100_vm4 }
  0x97   :  { %758 = vmatpush.bf16.msra.mxu0 %v1846_v54 }
  0x9a   :  { %1347 = vmatmul.msk.bf16.gmra.mxu0 %vm1346_vm6, %v1678_v63  ;;  %1355 = vmatmul.msk.bf16.gmra.mxu1 %vm1346_vm6, %v1678_v63 }
  0x9b   :  { %759 = vmatpush.bf16.msra.mxu0 %v1856_v62 }
  0xa3   :  { %v361_v0 = vpop.f32.mrf.mxu2 }
  0xab   :  { %v363_v2 = vpop.f32.mrf.mxu2 }
  0xac   :  { %v1396_v2 = vld [vmem:[#allocation5 + $0x20] sm:$0xf] }
 0x107   :  { %v223_v3 = vpop.f32.mrf.mxu0  ;;  %v252_v4 = vpop.f32.mrf.mxu1 }
 0x108   :  { %v365_v5 = vadd.f32 %v361_v0, %v223_v3  ;;  %274 = vst.msk [vmem:[#allocation2 + $0x8] sm:$0xff] %vm273_vm0, %v252_v4  ;;  %v1496_v0 = vld [vmem:[#allocation5 + $0x34] sm:$0xf]  ;;  %v1495_v3 = vld [vmem:[#allocation5 + $0x24] sm:$0xf0] }
 0x109   :  { %v1862_v4 = vor.u32 %v1496_v0, %v1406_v1 }
 0x10a   :  { %1521 = vtanh.f32 %v365_v5  ;;  %v368_v23 = vmul.f32 0.5, %v365_v5  ;;  %v1866_v5 = vor.u32 %v1495_v3, %v1396_v2 }
 0x10b   :  { %490 = vmatpush.bf16.msrb.mxu2 %v1862_v4  ;;  %584 = vmatpush.bf16.msrb.mxu3 %v1862_v4 }
 0x10c   :  { %478 = vmatpush.bf16.msrb.mxu1 %v1866_v5  ;;  %760 = vmatpush.bf16.msra.mxu0 %v1866_v5 }
 0x10f   :  { %v1801_v7 = vpop.f32.mrf.mxu0  ;;  %v254_v8 = vpop.f32.mrf.mxu1  ;;  %v323_v12 = vld [vmem:[#allocation2 + $0x8] sm:$0xff] }
 0x110   :  { %v1522_v9 = vpop.eup %1521  ;;  %276 = vst.msk [vmem:[#allocation2 + $0x18] sm:$0xff] %vm273_vm0, %v254_v8  ;;  %v1398_v8 = vld [vmem:[#allocation5 + $0x28] sm:$0xf0] }
 0x111   :  { %v367_v10 = vadd.f32 1.0, %v1522_v9  ;;  %v1388_v9 = vld [vmem:[#allocation5 + $0x10] sm:$0xf] }
 0x113   :  { %v372_v11 = vmul.f32 %v367_v10, %v1775_v44  ;;  %v1493_v10 = vld [vmem:[#allocation5 + $0x14] sm:$0xf0] }
 0x115   :  { %v373_v13 = vadd.f32 %v372_v11, %v323_v12  ;;  %v1870_v11 = vor.u32 %v1494_v6, %v1398_v8  ;;  %v94_v12 = vpop.permute.xlu1 %93 }
 0x116   :  { %vm104_vm10 = vcmp.eq.s32.totalorder %v1788_v61, %v94_v12 }
 0x117   :  { %1523 = vtanh.f32 %v373_v13  ;;  %491 = vmatpush.bf16.msrb.mxu2 %v1870_v11  ;;  %585 = vmatpush.bf16.msrb.mxu3 %v1870_v11 }
 0x118   :  { %1525 = vtanh.f32 %v368_v23 }
 0x11d   :  { %v1524_v14 = vpop.eup %1523  ;;  %v389_v32 = vpop.permute.xlu1 %388 }
 0x11e   :  { %v376_v15 = vsub.f32 %v1524_v14, %v1775_v44  ;;  %v1526_v24 = vpop.eup %1525  ;;  %v1874_v14 = vor.u32 %v1493_v10, %v1388_v9 }
 0x11f   :  { %v370_v25 = vadd.f32 1.0, %v1526_v24  ;;  %v1382_v24 = vld [vmem:[#allocation5 + $0x8] sm:$0xf0] }
 0x120   :  { %378 = vrot.lane.b32.xlu2 %v376_v15, %s1679_s20  ;;  %v1492_v15 = vld [vmem:[#allocation5 + $0x14] sm:$0xf]  ;;  %479 = vmatpush.bf16.msrb.mxu1 %v1874_v14 }
 0x121   :  { %v371_v26 = vmul.f32 0.5, %v370_v25  ;;  %761 = vmatpush.bf16.msra.mxu0 %v1874_v14 }
 0x123   :  { %v375_v33 = vsub.f32 1.0, %v371_v26  ;;  %v257_v26 = vpop.f32.mrf.mxu1 }
 0x124   :  { %278 = vst.msk [vmem:[#allocation2 + $0x28] sm:$0xff] %vm273_vm0, %v257_v26 }
 0x128   :  { %87 = vperm.xlu2 %1519, %v70_v17   ;;  %v1390_v17 = vld [vmem:[#allocation5 + $0x18] sm:$0xf0] }
 0x129   :  { %v1880_v21 = vor.u32 %v1492_v15, %v1390_v17 }
 0x12b   :  { %492 = vmatpush.bf16.msrb.mxu2 %v1880_v21  ;;  %586 = vmatpush.bf16.msrb.mxu3 %v1880_v21  ;;  %v259_v29 = vpop.f32.mrf.mxu1 }
 0x12c   :  { %280 = vst.msk [vmem:[#allocation2 + $0x38] sm:$0xff] %vm273_vm0, %v259_v29 }
 0x130   :  { %96 = vperm.xlu2 %1519, %v73_v18   ;;  %v1380_v18 = vld [vmem:[#allocation5] sm:$0xf] }
 0x131   :  { %v1884_v23 = vor.u32 %v1491_v19, %v1380_v18 }
 0x133   :  { %480 = vmatpush.bf16.msrb.mxu1 %v1884_v23  ;;  %762 = vmatpush.bf16.msra.mxu0 %v1884_v23 }
 0x137   :  { %661 = vmatpush.bf16.msra.mxu1 %v1824_v31 }
 0x13b   :  { %662 = vmatpush.bf16.msra.mxu1 %v1827_v34 }
 0x13f   :  { %663 = vmatpush.bf16.msra.mxu1 %v1837_v47 }
 0x143   :  { %664 = vmatpush.bf16.msra.mxu1 %v1846_v54 }
 0x147   :  { %665 = vmatpush.bf16.msra.mxu1 %v1856_v62 }
 0x14b   :  { %666 = vmatpush.bf16.msra.mxu1 %v1866_v5 }
 0x14f   :  { %667 = vmatpush.bf16.msra.mxu1 %v1874_v14 }
 0x153   :  { %668 = vmatpush.bf16.msra.mxu1 %v1884_v23 }
 0x17a   :  { %v379_v42 = vpop.permute.xlu2 %378 }
 0x17b   :  { %v381_v45 = vmul.f32 %v379_v42, %v375_v33 }
 0x17d   :  { %383 = vrot.lane.b32.xlu0 %v381_v45, %s1679_s20 }
 0x182   :  { %v88_v59 = vpop.permute.xlu2 %87 }
 0x183   :  { %vm102_vm8 = vcmp.eq.s32.totalorder %v1788_v61, %v88_v59  ;;  %v1966_v59 = vperm.slane %v313_v50, 1 }
 0x184   :  { %vm1348_vm9 = vmpackc.low %vm103_vm7, %vm102_vm8 }
 0x185   :  { %1349 = vmatmul.msk.bf16.gmra.mxu0 %vm1348_vm9, %v1678_v63  ;;  %1357 = vmatmul.msk.bf16.gmra.mxu1 %vm1348_vm9, %v1678_v63 }
 0x18a   :  { %v97_v13 = vpop.permute.xlu2 %96 }
 0x18b   :  { %vm105_vm11 = vcmp.eq.s32.totalorder %v1788_v61, %v97_v13  ;;  %v1490_v61 = vld [vmem:[#allocation5 + $0x4] sm:$0xf] }
 0x18c   :  { %vm1350_vm12 = vmpackc.low %vm105_vm11, %vm104_vm10  ;;  %v1901_v25 = vor.u32 %v1490_v61, %v1382_v24 }
 0x18e   :  { %493 = vmatpush.bf16.msrb.mxu2 %v1901_v25  ;;  %587 = vmatpush.bf16.msrb.mxu3 %v1901_v25 }
 0x192   :  { %567 = vmatpush.bf16.msra.mxu2 %v1824_v31 }
 0x195   :  { %1351 = vmatmul.msk.bf16.gmra.mxu0 %vm1350_vm12, %v1678_v63  ;;  %1359 = vmatmul.msk.bf16.gmra.mxu1 %vm1350_vm12, %v1678_v63  ;;  %v1903_v63 = vpop.f32.mrf.mxu0 }
 0x196   :  { %568 = vmatpush.bf16.msra.mxu2 %v1827_v34 }
 0x19a   :  { %569 = vmatpush.bf16.msra.mxu2 %v1837_v47 }
 0x19d   :  { %v1910_v28 = vpop.f32.mrf.mxu0 }
 0x19e   :  { %570 = vmatpush.bf16.msra.mxu2 %v1846_v54 }
 0x1a2   :  { %571 = vmatpush.bf16.msra.mxu2 %v1856_v62 }
 0x1a6   :  { %572 = vmatpush.bf16.msra.mxu2 %v1866_v5 }
 0x1aa   :  { %573 = vmatpush.bf16.msra.mxu2 %v1874_v14 }
 0x1ae   :  { %574 = vmatpush.bf16.msra.mxu2 %v1884_v23 }
 0x1ef   :  { %v384_v30 = vpop.permute.xlu0 %383 }
 0x1f0   :  { %v1919_v33 = vadd.f32 %v384_v30, %v1775_v44 }
 0x1f2   :  { %v391_v35 = vsel %vm273_vm0, %v1919_v33, %v389_v32  ;;  %v522_v36 = vpack.c.bf16 %v1919_v33, %v1919_v33 }
 0x1f3   :  { %v392_v37 = vpack.c.bf16 %v391_v35, %v391_v35 }
 0x1f4   :  { %1442 = vmatmul.msk.bf16.vlgmr.msra.gmra.mxu3 %vm273_vm0, %v522_v36 }
 0x1f5   :  { %481 = vmatmul.bf16.vlgmr.msrb.gmra.mxu1 %v392_v37  ;;  %494 = vmatmul.bf16.vlgmr.msrb.gmra.mxu2 %v392_v37 }
 0x1f6   :  { %718 = vmatpush.bf16.msra.mxu3 %v1742_v16  ;;  %674 = vmatpush.bf16.msrb.mxu2 %v1830_v39 }
 0x1f7   :  { %768 = vmatpush.bf16.msrb.mxu1 %v1830_v39 }
 0x1fa   :  { %719 = vmatpush.bf16.msra.mxu3 %v1751_v20  ;;  %675 = vmatpush.bf16.msrb.mxu2 %v1833_v46 }
 0x1fb   :  { %769 = vmatpush.bf16.msrb.mxu1 %v1833_v46 }
 0x1fe   :  { %720 = vmatpush.bf16.msra.mxu3 %v1758_v27  ;;  %676 = vmatpush.bf16.msrb.mxu2 %v1842_v52 }
 0x1ff   :  { %770 = vmatpush.bf16.msrb.mxu1 %v1842_v52 }
 0x202   :  { %v1936_v44 = vpop.f32.mrf.mxu0  ;;  %v262_v38 = vpop.f32.mrf.mxu1  ;;  %721 = vmatpush.bf16.msra.mxu3 %v1769_v43  ;;  %677 = vmatpush.bf16.msrb.mxu2 %v1852_v60 }
 0x203   :  { %771 = vmatpush.bf16.msrb.mxu1 %v1852_v60  ;;  %282 = vst.msk [vmem:[#allocation2 + $0x48] sm:$0xff] %vm273_vm0, %v262_v38 }
 0x206   :  { %678 = vmatpush.bf16.msrb.mxu2 %v1862_v4 }
 0x207   :  { %772 = vmatpush.bf16.msrb.mxu1 %v1862_v4 }
 0x20a   :  { %v1944_v40 = vpop.f32.mrf.mxu0  ;;  %v264_v41 = vpop.f32.mrf.mxu1  ;;  %679 = vmatpush.bf16.msrb.mxu2 %v1870_v11 }
 0x20b   :  { %773 = vmatpush.bf16.msrb.mxu1 %v1870_v11  ;;  %284 = vst.msk [vmem:[#allocation2 + $0x58] sm:$0xff] %vm273_vm0, %v264_v41 }
 0x20e   :  { %680 = vmatpush.bf16.msrb.mxu2 %v1880_v21 }
 0x20f   :  { %774 = vmatpush.bf16.msrb.mxu1 %v1880_v21 }
 0x212   :  { %v1951_v42 = vpop.f32.mrf.mxu0  ;;  %v267_v45 = vpop.f32.mrf.mxu1  ;;  %681 = vmatpush.bf16.msrb.mxu2 %v1901_v25 }
 0x213   :  { %775 = vmatpush.bf16.msrb.mxu1 %v1901_v25  ;;  %286 = vst.msk [vmem:[#allocation2 + $0x68] sm:$0xff] %vm273_vm0, %v267_v45 }
 0x21a   :  { %v1956_v48 = vpop.f32.mrf.mxu0  ;;  %v269_v49 = vpop.f32.mrf.mxu1 }
 0x21b   :  { %288 = vst.msk [vmem:[#allocation2 + $0x78] sm:$0xff] %vm273_vm0, %v269_v49 }
 0x272   :  { %v482_v53 = vpop.f32.mrf.mxu1 }
 0x273   :  { %v483_v55 = vadd.f32 %v482_v53, %v1962_v51 }
 0x275   :  { %1527 = vtanh.f32 %v483_v55  ;;  %v501_v26 = vmul.f32 0.5, %v483_v55 }
 0x277   :  { %v535_v56 = vpop.f32.mrf.mxu3 }
 0x278   :  { %v539_v57 = vadd.f32 %v535_v56, %v1801_v7  ;;  %v495_v58 = vpop.f32.mrf.mxu2  ;;  %v521_v7 = vld [vmem:[#allocation2 + $0x18] sm:$0xff] }
 0x279   :  { %v496_v3 = vadd.f32 %v495_v58, %v1966_v59 }
 0x27a   :  { %1529 = vtanh.f32 %v539_v57  ;;  %v484_v0 = vpop.f32.mrf.mxu1  ;;  %v542_v38 = vmul.f32 0.5, %v539_v57 }
 0x27b   :  { %v1528_v1 = vpop.eup %1527 }
 0x27c   :  { %v500_v2 = vadd.f32 1.0, %v1528_v1 }
 0x27e   :  { %v505_v6 = vmul.f32 %v1820_v22, %v500_v2 }
 0x27f   :  { %v537_v8 = vpop.f32.mrf.mxu3 }
 0x280   :  { %v1530_v9 = vpop.eup %1529  ;;  %v506_v10 = vadd.f32 %v505_v6, %v496_v3  ;;  %v497_v12 = vpop.f32.mrf.mxu2 }
 0x281   :  { %v541_v13 = vadd.f32 1.0, %v1530_v9 }
 0x282   :  { %1531 = vtanh.f32 %v506_v10 }
 0x283   :  { %v546_v15 = vmul.f32 %v541_v13, %v1919_v33  ;;  %v615_v13 = vld [vmem:[#allocation2 + $0x28] sm:$0xff] }
 0x285   :  { %v547_v17 = vadd.f32 %v546_v15, %v521_v7 }
 0x287   :  { %1533 = vtanh.f32 %v547_v17 }
 0x288   :  { %v1532_v18 = vpop.eup %1531  ;;  %1535 = vtanh.f32 %v501_v26 }
 0x289   :  { %v509_v19 = vsub.f32 %v1532_v18, %v1820_v22  ;;  %1537 = vtanh.f32 %v542_v38 }
 0x28b   :  { %511 = vrot.lane.b32.xlu2 %v509_v19, %s1679_s20 }
 0x28d   :  { %v1534_v61 = vpop.eup %1533 }
 0x28e   :  { %v550_v24 = vsub.f32 %v1534_v61, %v1919_v33  ;;  %v1536_v29 = vpop.eup %1535 }
 0x28f   :  { %v503_v30 = vadd.f32 1.0, %v1536_v29  ;;  %v1538_v41 = vpop.eup %1537 }
 0x290   :  { %552 = vrot.lane.b32.xlu0 %v550_v24, %s1679_s20  ;;  %v544_v45 = vadd.f32 1.0, %v1538_v41 }
 0x291   :  { %v504_v32 = vmul.f32 0.5, %v503_v30 }
 0x292   :  { %v545_v49 = vmul.f32 0.5, %v544_v45 }
 0x293   :  { %v508_v35 = vsub.f32 1.0, %v504_v32 }
 0x294   :  { %v549_v50 = vsub.f32 1.0, %v545_v49 }
 0x2e5   :  { %v512_v36 = vpop.permute.xlu2 %511 }
 0x2e6   :  { %v514_v37 = vmul.f32 %v512_v36, %v508_v35 }
 0x2e8   :  { %516 = vrot.lane.b32.xlu1 %v514_v37, %s1679_s20 }
 0x302   :  { %v553_v53 = vpop.permute.xlu0 %552 }
 0x303   :  { %v555_v56 = vmul.f32 %v553_v53, %v549_v50 }
 0x305   :  { %557 = vrot.lane.b32.xlu2 %v555_v56, %s1679_s20 }
 0x35a   :  { %v517_v55 = vpop.permute.xlu1 %516 }
 0x35b   :  { %v1978_v58 = vadd.f32 %v1820_v22, %v517_v55 }
 0x35d   :  { %562 = vrot.lane.b32.xlu0 %v1978_v58, %s1679_s20 }
 0x35f   :  { %v558_v0 = vpop.permute.xlu2 %557 }
 0x360   :  { %v1983_v1 = vadd.f32 %v558_v0, %v1919_v33 }
 0x362   :  { %v616_v57 = vpack.c.bf16 %v1983_v1, %v1983_v1 }
 0x364   :  { %1443 = vmatmul.msk.bf16.vlgmr.msrb.gmra.mxu0 %vm273_vm0, %v616_v57 }
 0x365   :  { %906 = vmatpush.bf16.msrb.mxu0 %v1742_v16 }
 0x369   :  { %907 = vmatpush.bf16.msrb.mxu0 %v1751_v20 }
 0x36d   :  { %908 = vmatpush.bf16.msrb.mxu0 %v1758_v27 }
 0x371   :  { %909 = vmatpush.bf16.msrb.mxu0 %v1769_v43 }
 0x3cf   :  { %v563_v22 = vpop.permute.xlu0 %562 }
 0x3d0   :  { %v565_v2 = vsel %vm273_vm0, %v1983_v1, %v563_v22 }
 0x3d1   :  { %v566_v3 = vpack.c.bf16 %v565_v2, %v565_v2 }
 0x3d3   :  { %575 = vmatmul.bf16.vlgmr.msra.gmra.mxu2 %v566_v3  ;;  %588 = vmatmul.bf16.vlgmr.msrb.gmra.mxu3 %v566_v3 }
 0x3d4   :  { %812 = vmatpush.bf16.msrb.mxu3 %v1742_v16  ;;  %849 = vmatpush.bf16.msra.mxu2 %v1824_v31 }
 0x3d8   :  { %813 = vmatpush.bf16.msrb.mxu3 %v1751_v20  ;;  %850 = vmatpush.bf16.msra.mxu2 %v1827_v34 }
 0x3dc   :  { %814 = vmatpush.bf16.msrb.mxu3 %v1758_v27  ;;  %851 = vmatpush.bf16.msra.mxu2 %v1837_v47 }
 0x3e0   :  { %815 = vmatpush.bf16.msrb.mxu3 %v1769_v43  ;;  %852 = vmatpush.bf16.msra.mxu2 %v1846_v54 }
 0x3e1   :  { %v629_v33 = vpop.f32.mrf.mxu0 }
 0x3e2   :  { %v633_v6 = vadd.f32 %v629_v33, %v1903_v63 }
 0x3e4   :  { %1539 = vtanh.f32 %v633_v6  ;;  %853 = vmatpush.bf16.msra.mxu2 %v1856_v62  ;;  %v636_v61 = vmul.f32 0.5, %v633_v6 }
 0x3e8   :  { %854 = vmatpush.bf16.msra.mxu2 %v1866_v5 }
 0x3e9   :  { %v631_v8 = vpop.f32.mrf.mxu0 }
 0x3ea   :  { %v1540_v9 = vpop.eup %1539 }
 0x3eb   :  { %v635_v10 = vadd.f32 1.0, %v1540_v9 }
 0x3ec   :  { %855 = vmatpush.bf16.msra.mxu2 %v1874_v14 }
 0x3ed   :  { %v640_v12 = vmul.f32 %v635_v10, %v1983_v1 }
 0x3ef   :  { %v641_v15 = vadd.f32 %v640_v12, %v615_v13 }
 0x3f0   :  { %856 = vmatpush.bf16.msra.mxu2 %v1884_v23 }
 0x3f1   :  { %1541 = vtanh.f32 %v641_v15 }
 0x3f7   :  { %v1542_v7 = vpop.eup %1541 }
 0x3f8   :  { %v644_v63 = vsub.f32 %v1542_v7, %v1983_v1 }
 0x3fa   :  { %646 = vrot.lane.b32.xlu2 %v644_v63, %s1679_s20 }
 0x454   :  { %v647_v50 = vpop.permute.xlu2 %646 }
 0x456   :  { %v576_v17 = vpop.f32.mrf.mxu2  ;;  %v589_v18 = vpop.f32.mrf.mxu3 }
 0x457   :  { %v577_v19 = vadd.f32 %v576_v17, %v1962_v51  ;;  %v590_v32 = vadd.f32 %v589_v18, %v1966_v59  ;;  %v709_v18 = vld [vmem:[#allocation2 + $0x38] sm:$0xff] }
 0x459   :  { %1543 = vtanh.f32 %v577_v19  ;;  %v595_v55 = vmul.f32 0.5, %v577_v19 }
 0x45a   :  { %1545 = vtanh.f32 %v636_v61 }
 0x45e   :  { %v578_v24 = vpop.f32.mrf.mxu2  ;;  %v591_v26 = vpop.f32.mrf.mxu3 }
 0x45f   :  { %v1544_v29 = vpop.eup %1543 }
 0x460   :  { %v594_v30 = vadd.f32 1.0, %v1544_v29  ;;  %v1546_v37 = vpop.eup %1545 }
 0x461   :  { %v638_v38 = vadd.f32 1.0, %v1546_v37 }
 0x462   :  { %v599_v35 = vmul.f32 %v594_v30, %v1978_v58 }
 0x463   :  { %v639_v49 = vmul.f32 0.5, %v638_v38 }
 0x464   :  { %v600_v36 = vadd.f32 %v599_v35, %v590_v32 }
 0x465   :  { %v643_v53 = vsub.f32 1.0, %v639_v49 }
 0x466   :  { %1547 = vtanh.f32 %v600_v36 }
 0x467   :  { %v649_v56 = vmul.f32 %v647_v50, %v643_v53  ;;  %1549 = vtanh.f32 %v595_v55 }
 0x46c   :  { %v1548_v41 = vpop.eup %1547 }
 0x46d   :  { %v603_v45 = vsub.f32 %v1548_v41, %v1978_v58  ;;  %v1550_v0 = vpop.eup %1549 }
 0x46e   :  { %v597_v57 = vadd.f32 1.0, %v1550_v0 }
 0x46f   :  { %605 = vrot.lane.b32.xlu1 %v603_v45, %s1679_s20 }
 0x470   :  { %v598_v22 = vmul.f32 0.5, %v597_v57 }
 0x472   :  { %v602_v2 = vsub.f32 1.0, %v598_v22 }
 0x477   :  { %651 = vrot.lane.b32.xlu1 %v649_v56, %s1679_s20 }
 0x4e1   :  { %v606_v3 = vpop.permute.xlu1 %605 }
 0x4e2   :  { %v608_v33 = vmul.f32 %v606_v3, %v602_v2 }
 0x4e4   :  { %610 = vrot.lane.b32.xlu0 %v608_v33, %s1679_s20 }
 0x4e9   :  { %v652_v6 = vpop.permute.xlu1 %651 }
 0x4ea   :  { %v2018_v8 = vadd.f32 %v652_v6, %v1983_v1 }
 0x4ec   :  { %v710_v9 = vpack.c.bf16 %v2018_v8, %v2018_v8 }
 0x4ee   :  { %1444 = vmatmul.msk.bf16.vlgmr.msra.gmra.mxu3 %vm273_vm0, %v710_v9 }
 0x4ef   :  { %862 = vmatpush.bf16.msra.mxu3 %v1830_v39 }
 0x4f3   :  { %863 = vmatpush.bf16.msra.mxu3 %v1833_v46 }
 0x4f7   :  { %864 = vmatpush.bf16.msra.mxu3 %v1842_v52 }
 0x4fb   :  { %865 = vmatpush.bf16.msra.mxu3 %v1852_v60 }
 0x4ff   :  { %866 = vmatpush.bf16.msra.mxu3 %v1862_v4 }
 0x503   :  { %867 = vmatpush.bf16.msra.mxu3 %v1870_v11 }
 0x507   :  { %868 = vmatpush.bf16.msra.mxu3 %v1880_v21 }
 0x50b   :  { %869 = vmatpush.bf16.msra.mxu3 %v1901_v25 }
 0x556   :  { %v611_v1 = vpop.permute.xlu0 %610 }
 0x557   :  { %v2032_v10 = vadd.f32 %v611_v1, %v1978_v58 }
 0x559   :  { %656 = vrot.lane.b32.xlu2 %v2032_v10, %s1679_s20 }
 0x571   :  { %v723_v12 = vpop.f32.mrf.mxu3 }
 0x572   :  { %v727_v13 = vadd.f32 %v723_v12, %v1910_v28 }
 0x574   :  { %1551 = vtanh.f32 %v727_v13 }
 0x579   :  { %v725_v15 = vpop.f32.mrf.mxu3 }
 0x57a   :  { %v1552_v7 = vpop.eup %1551 }
 0x57b   :  { %v729_v63 = vadd.f32 1.0, %v1552_v7 }
 0x57d   :  { %v734_v17 = vmul.f32 %v729_v63, %v2018_v8 }
 0x57f   :  { %v735_v19 = vadd.f32 %v734_v17, %v709_v18 }
 0x581   :  { %1553 = vtanh.f32 %v735_v19 }
 0x587   :  { %v1554_v61 = vpop.eup %1553 }
 0x588   :  { %v738_v24 = vsub.f32 %v1554_v61, %v2018_v8 }
 0x58a   :  { %740 = vrot.lane.b32.xlu1 %v738_v24, %s1679_s20 }
 0x5b3   :  { %v657_v26 = vpop.permute.xlu2 %656 }
 0x5b4   :  { %v659_v29 = vsel %vm273_vm0, %v2018_v8, %v657_v26  ;;  %v803_v26 = vld [vmem:[#allocation2 + $0x48] sm:$0xff] }
 0x5b5   :  { %v660_v30 = vpack.c.bf16 %v659_v29, %v659_v29 }
 0x5b7   :  { %669 = vmatmul.bf16.vlgmr.msra.gmra.mxu1 %v660_v30  ;;  %682 = vmatmul.bf16.vlgmr.msrb.gmra.mxu2 %v660_v30 }
 0x5b8   :  { %1000 = vmatpush.bf16.msrb.mxu2 %v1742_v16  ;;  %943 = vmatpush.bf16.msra.mxu1 %v1824_v31 }
 0x5bc   :  { %1001 = vmatpush.bf16.msrb.mxu2 %v1751_v20  ;;  %944 = vmatpush.bf16.msra.mxu1 %v1827_v34 }
 0x5c0   :  { %1002 = vmatpush.bf16.msrb.mxu2 %v1758_v27  ;;  %945 = vmatpush.bf16.msra.mxu1 %v1837_v47  ;;  %v730_v27 = vmul.f32 0.5, %v727_v13 }
 0x5c4   :  { %1003 = vmatpush.bf16.msrb.mxu2 %v1769_v43  ;;  %946 = vmatpush.bf16.msra.mxu1 %v1846_v54 }
 0x5c8   :  { %947 = vmatpush.bf16.msra.mxu1 %v1856_v62 }
 0x5cc   :  { %948 = vmatpush.bf16.msra.mxu1 %v1866_v5 }
 0x5d0   :  { %949 = vmatpush.bf16.msra.mxu1 %v1874_v14 }
 0x5d4   :  { %950 = vmatpush.bf16.msra.mxu1 %v1884_v23 }
 0x5fc   :  { %v741_v55 = vpop.permute.xlu1 %740 }
 0x634   :  { %v670_v16 = vpop.f32.mrf.mxu1 }
 0x635   :  { %v671_v20 = vadd.f32 %v670_v16, %v1962_v51 }
 0x637   :  { %1555 = vtanh.f32 %v671_v20  ;;  %v689_v22 = vmul.f32 0.5, %v671_v20 }
 0x638   :  { %1557 = vtanh.f32 %v730_v27 }
 0x63a   :  { %v683_v28 = vpop.f32.mrf.mxu2 }
 0x63b   :  { %v684_v43 = vadd.f32 %v683_v28, %v1966_v59 }
 0x63c   :  { %v672_v32 = vpop.f32.mrf.mxu1 }
 0x63d   :  { %v1556_v35 = vpop.eup %1555 }
 0x63e   :  { %v688_v36 = vadd.f32 1.0, %v1556_v35  ;;  %v1558_v45 = vpop.eup %1557 }
 0x63f   :  { %v732_v49 = vadd.f32 1.0, %v1558_v45 }
 0x640   :  { %v693_v37 = vmul.f32 %v688_v36, %v2032_v10 }
 0x641   :  { %v733_v56 = vmul.f32 0.5, %v732_v49 }
 0x642   :  { %v694_v38 = vadd.f32 %v693_v37, %v684_v43  ;;  %v685_v41 = vpop.f32.mrf.mxu2 }
 0x643   :  { %v737_v0 = vsub.f32 1.0, %v733_v56 }
 0x644   :  { %1559 = vtanh.f32 %v694_v38 }
 0x645   :  { %v743_v57 = vmul.f32 %v741_v55, %v737_v0  ;;  %1561 = vtanh.f32 %v689_v22 }
 0x64a   :  { %v1560_v50 = vpop.eup %1559 }
 0x64b   :  { %v697_v53 = vsub.f32 %v1560_v50, %v2032_v10  ;;  %v1562_v2 = vpop.eup %1561 }
 0x64c   :  { %v691_v3 = vadd.f32 1.0, %v1562_v2 }
 0x64d   :  { %699 = vrot.lane.b32.xlu0 %v697_v53, %s1679_s20 }
 0x64e   :  { %v692_v33 = vmul.f32 0.5, %v691_v3 }
 0x650   :  { %v696_v6 = vsub.f32 1.0, %v692_v33 }
 0x655   :  { %745 = vrot.lane.b32.xlu0 %v743_v57, %s1679_s20 }
 0x6bf   :  { %v700_v9 = vpop.permute.xlu0 %699 }
 0x6c0   :  { %v702_v1 = vmul.f32 %v700_v9, %v696_v6 }
 0x6c2   :  { %704 = vrot.lane.b32.xlu2 %v702_v1, %s1679_s20 }
 0x6c7   :  { %v746_v12 = vpop.permute.xlu0 %745 }
 0x6c8   :  { %v2062_v13 = vadd.f32 %v746_v12, %v2018_v8 }
 0x6ca   :  { %v804_v15 = vpack.c.bf16 %v2062_v13, %v2062_v13 }
 0x6cc   :  { %1445 = vmatmul.msk.bf16.vlgmr.msrb.gmra.mxu3 %vm273_vm0, %v804_v15 }
 0x6cd   :  { %1037 = vmatpush.bf16.msrb.mxu3 %v1824_v31 }
 0x6d1   :  { %1038 = vmatpush.bf16.msrb.mxu3 %v1827_v34 }
 0x6d5   :  { %1039 = vmatpush.bf16.msrb.mxu3 %v1837_v47 }
 0x6d9   :  { %1040 = vmatpush.bf16.msrb.mxu3 %v1846_v54 }
 0x6dd   :  { %1041 = vmatpush.bf16.msrb.mxu3 %v1856_v62 }
 0x6e1   :  { %1042 = vmatpush.bf16.msrb.mxu3 %v1866_v5 }
 0x6e5   :  { %1043 = vmatpush.bf16.msrb.mxu3 %v1874_v14 }
 0x6e9   :  { %1044 = vmatpush.bf16.msrb.mxu3 %v1884_v23 }
 0x71c   :  { %v705_v8 = vpop.permute.xlu2 %704 }
 0x71d   :  { %v2076_v7 = vadd.f32 %v705_v8, %v2032_v10 }
 0x71f   :  { %750 = vrot.lane.b32.xlu1 %v2076_v7, %s1679_s20 }
 0x74f   :  { %v817_v63 = vpop.f32.mrf.mxu3 }
 0x750   :  { %v821_v17 = vadd.f32 %v817_v63, %v1936_v44 }
 0x752   :  { %1563 = vtanh.f32 %v821_v17  ;;  %v824_v36 = vmul.f32 0.5, %v821_v17 }
 0x757   :  { %v819_v18 = vpop.f32.mrf.mxu3 }
 0x758   :  { %v1564_v19 = vpop.eup %1563 }
 0x759   :  { %v823_v61 = vadd.f32 1.0, %v1564_v19 }
 0x75b   :  { %v828_v24 = vmul.f32 %v823_v61, %v2062_v13  ;;  %v897_v61 = vld [vmem:[#allocation2 + $0x58] sm:$0xff] }
 0x75d   :  { %v829_v29 = vadd.f32 %v828_v24, %v803_v26 }
 0x75f   :  { %1565 = vtanh.f32 %v829_v29 }
 0x765   :  { %v1566_v30 = vpop.eup %1565 }
 0x766   :  { %v832_v16 = vsub.f32 %v1566_v30, %v2062_v13 }
 0x768   :  { %834 = vrot.lane.b32.xlu0 %v832_v16, %s1679_s20  ;;  %v1618_v16 = vld [vmem:[%s2287_s3 + $0x10] sm:$0xff] }
 0x791   :  { %v751_v20 = vpop.permute.xlu1 %750 }
 0x792   :  { %v753_v28 = vsel %vm273_vm0, %v2062_v13, %v751_v20  ;;  %v1619_v20 = vld [vmem:[%s2287_s3 + $0x8] sm:$0xff] }
 0x793   :  { %v754_v27 = vpack.c.bf16 %v753_v28, %v753_v28  ;;  %v1620_v28 = vld [vmem:[%s2287_s3] sm:$0xff] }
 0x795   :  { %763 = vmatmul.bf16.vlgmr.msra.gmra.mxu0 %v754_v27  ;;  %776 = vmatmul.bf16.vlgmr.msrb.gmra.mxu1 %v754_v27 }
 0x796   :  { %956 = vmatpush.bf16.msra.mxu0 %v1830_v39  ;;  %1050 = vmatpush.bf16.msrb.mxu1 %v1830_v39 }
 0x79a   :  { %957 = vmatpush.bf16.msra.mxu0 %v1833_v46  ;;  %1051 = vmatpush.bf16.msrb.mxu1 %v1833_v46 }
 0x79e   :  { %958 = vmatpush.bf16.msra.mxu0 %v1842_v52  ;;  %1052 = vmatpush.bf16.msrb.mxu1 %v1842_v52 }
 0x7a2   :  { %959 = vmatpush.bf16.msra.mxu0 %v1852_v60  ;;  %1053 = vmatpush.bf16.msrb.mxu1 %v1852_v60 }
 0x7a6   :  { %960 = vmatpush.bf16.msra.mxu0 %v1862_v4  ;;  %1054 = vmatpush.bf16.msrb.mxu1 %v1862_v4 }
 0x7aa   :  { %961 = vmatpush.bf16.msra.mxu0 %v1870_v11  ;;  %1055 = vmatpush.bf16.msrb.mxu1 %v1870_v11 }
 0x7ae   :  { %962 = vmatpush.bf16.msra.mxu0 %v1880_v21  ;;  %1056 = vmatpush.bf16.msrb.mxu1 %v1880_v21 }
 0x7b2   :  { %963 = vmatpush.bf16.msra.mxu0 %v1901_v25  ;;  %1057 = vmatpush.bf16.msrb.mxu1 %v1901_v25 }
 0x7da   :  { %v835_v22 = vpop.permute.xlu0 %834 }
 0x812   :  { %v764_v44 = vpop.f32.mrf.mxu0  ;;  %v777_v32 = vpop.f32.mrf.mxu1 }
 0x813   :  { %v765_v35 = vadd.f32 %v764_v44, %v1962_v51  ;;  %v778_v45 = vadd.f32 %v777_v32, %v1966_v59 }
 0x815   :  { %1567 = vtanh.f32 %v765_v35  ;;  %v783_v33 = vmul.f32 0.5, %v765_v35 }
 0x816   :  { %1569 = vtanh.f32 %v824_v36 }
 0x81a   :  { %v766_v43 = vpop.f32.mrf.mxu0  ;;  %v779_v37 = vpop.f32.mrf.mxu1 }
 0x81b   :  { %v1568_v38 = vpop.eup %1567 }
 0x81c   :  { %v782_v41 = vadd.f32 1.0, %v1568_v38  ;;  %v1570_v53 = vpop.eup %1569 }
 0x81d   :  { %v826_v56 = vadd.f32 1.0, %v1570_v53 }
 0x81e   :  { %v787_v49 = vmul.f32 %v782_v41, %v2076_v7 }
 0x81f   :  { %v827_v57 = vmul.f32 0.5, %v826_v56 }
 0x820   :  { %v788_v50 = vadd.f32 %v787_v49, %v778_v45 }
 0x821   :  { %v831_v2 = vsub.f32 1.0, %v827_v57 }
 0x822   :  { %1571 = vtanh.f32 %v788_v50 }
 0x823   :  { %v837_v3 = vmul.f32 %v835_v22, %v831_v2  ;;  %1573 = vtanh.f32 %v783_v33 }
 0x828   :  { %v1572_v55 = vpop.eup %1571 }
 0x829   :  { %v791_v0 = vsub.f32 %v1572_v55, %v2076_v7  ;;  %v1574_v6 = vpop.eup %1573 }
 0x82a   :  { %v785_v9 = vadd.f32 1.0, %v1574_v6 }
 0x82b   :  { %793 = vrot.lane.b32.xlu2 %v791_v0, %s1679_s20 }
 0x82c   :  { %v786_v1 = vmul.f32 0.5, %v785_v9 }
 0x82e   :  { %v790_v12 = vsub.f32 1.0, %v786_v1 }
 0x833   :  { %839 = vrot.lane.b32.xlu2 %v837_v3, %s1679_s20 }
 0x885   :  { %v794_v15 = vpop.permute.xlu2 %793 }
 0x886   :  { %v796_v8 = vmul.f32 %v794_v15, %v790_v12 }
 0x888   :  { %798 = vrot.lane.b32.xlu1 %v796_v8, %s1679_s20 }
 0x88d   :  { %v840_v63 = vpop.permute.xlu2 %839 }
 0x88e   :  { %v2110_v17 = vadd.f32 %v840_v63, %v2062_v13 }
 0x890   :  { %v898_v18 = vpack.c.bf16 %v2110_v17, %v2110_v17 }
 0x892   :  { %1446 = vmatmul.msk.bf16.vlgmr.msrb.gmra.mxu0 %vm273_vm0, %v898_v18 }
 0x893   :  { %1131 = vmatpush.bf16.msrb.mxu0 %v1824_v31 }
 0x897   :  { %1132 = vmatpush.bf16.msrb.mxu0 %v1827_v34 }
 0x89b   :  { %1133 = vmatpush.bf16.msrb.mxu0 %v1837_v47 }
 0x89f   :  { %1134 = vmatpush.bf16.msrb.mxu0 %v1846_v54 }
 0x8a3   :  { %1135 = vmatpush.bf16.msrb.mxu0 %v1856_v62 }
 0x8a7   :  { %1136 = vmatpush.bf16.msrb.mxu0 %v1866_v5 }
 0x8ab   :  { %1137 = vmatpush.bf16.msrb.mxu0 %v1874_v14 }
 0x8af   :  { %1138 = vmatpush.bf16.msrb.mxu0 %v1884_v23 }
 0x8fa   :  { %v799_v13 = vpop.permute.xlu1 %798 }
 0x8fb   :  { %v2124_v19 = vadd.f32 %v799_v13, %v2076_v7 }
 0x8fd   :  { %844 = vrot.lane.b32.xlu0 %v2124_v19, %s1679_s20 }
 0x90f   :  { %v911_v31 = vpop.f32.mrf.mxu0 }
 0x910   :  { %v915_v34 = vadd.f32 %v911_v31, %v1944_v40  ;;  %v1617_v40 = vld [vmem:[%s2287_s3 + $0x18] sm:$0xff]  ;;  %v991_v31 = vld [vmem:[#allocation2 + $0x68] sm:$0xff] }
 0x912   :  { %1575 = vtanh.f32 %v915_v34  ;;  %v918_v35 = vmul.f32 0.5, %v915_v34 }
 0x917   :  { %v913_v47 = vpop.f32.mrf.mxu0 }
 0x918   :  { %v1576_v54 = vpop.eup %1575 }
 0x919   :  { %v917_v62 = vadd.f32 1.0, %v1576_v54 }
 0x91b   :  { %v922_v5 = vmul.f32 %v917_v62, %v2110_v17 }
 0x91d   :  { %v923_v14 = vadd.f32 %v922_v5, %v897_v61 }
 0x91f   :  { %1577 = vtanh.f32 %v923_v14 }
 0x925   :  { %v1578_v23 = vpop.eup %1577 }
 0x926   :  { %v926_v24 = vsub.f32 %v1578_v23, %v2110_v17 }
 0x928   :  { %928 = vrot.lane.b32.xlu2 %v926_v24, %s1679_s20 }
 0x96f   :  { %v845_v26 = vpop.permute.xlu0 %844 }
 0x970   :  { %v847_v29 = vsel %vm273_vm0, %v2110_v17, %v845_v26 }
 0x971   :  { %v848_v30 = vpack.c.bf16 %v847_v29, %v847_v29 }
 0x973   :  { %857 = vmatmul.bf16.vlgmr.msra.gmra.mxu2 %v848_v30  ;;  %870 = vmatmul.bf16.vlgmr.msra.gmra.mxu3 %v848_v30 }
 0x974   :  { %1094 = vmatpush.bf16.msra.mxu2 %v1617_v40 }
 0x978   :  { %1095 = vmatpush.bf16.msra.mxu2 %v1618_v16 }
 0x97c   :  { %1096 = vmatpush.bf16.msra.mxu2 %v1619_v20 }
 0x980   :  { %1097 = vmatpush.bf16.msra.mxu2 %v1620_v28 }
 0x982   :  { %v929_v57 = vpop.permute.xlu2 %928 }
 0x9f6   :  { %v858_v27 = vpop.f32.mrf.mxu2  ;;  %v871_v44 = vpop.f32.mrf.mxu3 }
 0x9f7   :  { %v859_v32 = vadd.f32 %v858_v27, %v1962_v51  ;;  %v872_v41 = vadd.f32 %v871_v44, %v1966_v59 }
 0x9f9   :  { %1579 = vtanh.f32 %v859_v32  ;;  %v877_v3 = vmul.f32 0.5, %v859_v32 }
 0x9fa   :  { %1581 = vtanh.f32 %v918_v35 }
 0x9fe   :  { %v860_v36 = vpop.f32.mrf.mxu2  ;;  %v873_v43 = vpop.f32.mrf.mxu3 }
 0x9ff   :  { %v1580_v37 = vpop.eup %1579 }
 0xa00   :  { %v876_v38 = vadd.f32 1.0, %v1580_v37  ;;  %v1582_v50 = vpop.eup %1581 }
 0xa01   :  { %v920_v53 = vadd.f32 1.0, %v1582_v50 }
 0xa02   :  { %v881_v45 = vmul.f32 %v876_v38, %v2124_v19 }
 0xa03   :  { %v921_v0 = vmul.f32 0.5, %v920_v53 }
 0xa04   :  { %v882_v49 = vadd.f32 %v881_v45, %v872_v41 }
 0xa05   :  { %v925_v22 = vsub.f32 1.0, %v921_v0 }
 0xa06   :  { %1583 = vtanh.f32 %v882_v49 }
 0xa07   :  { %v931_v2 = vmul.f32 %v929_v57, %v925_v22  ;;  %1585 = vtanh.f32 %v877_v3 }
 0xa0c   :  { %v1584_v56 = vpop.eup %1583 }
 0xa0d   :  { %v885_v55 = vsub.f32 %v1584_v56, %v2124_v19  ;;  %v1586_v33 = vpop.eup %1585 }
 0xa0e   :  { %v879_v6 = vadd.f32 1.0, %v1586_v33 }
 0xa0f   :  { %887 = vrot.lane.b32.xlu1 %v885_v55, %s1679_s20 }
 0xa10   :  { %v880_v9 = vmul.f32 0.5, %v879_v6 }
 0xa12   :  { %v884_v1 = vsub.f32 1.0, %v880_v9 }
 0xa17   :  { %933 = vrot.lane.b32.xlu1 %v931_v2, %s1679_s20 }
 0xa81   :  { %v888_v12 = vpop.permute.xlu1 %887 }
 0xa82   :  { %v890_v15 = vmul.f32 %v888_v12, %v884_v1  ;;  %v1085_v12 = vld [vmem:[#allocation2 + $0x78] sm:$0xff] }
 0xa84   :  { %892 = vrot.lane.b32.xlu0 %v890_v15, %s1679_s20 }
 0xa89   :  { %v934_v8 = vpop.permute.xlu1 %933 }
 0xa8a   :  { %v2154_v63 = vadd.f32 %v934_v8, %v2110_v17 }
 0xa8c   :  { %v992_v18 = vpack.c.bf16 %v2154_v63, %v2154_v63 }
 0xa8e   :  { %1447 = vmatmul.msk.bf16.vlgmr.msrb.gmra.mxu2 %vm273_vm0, %v992_v18  ;;  %v1509_v18 = vld [vmem:[%s2290_s6 + $0x18] sm:$0xff] }
 0xa8f   :  { %1144 = vmatpush.bf16.msrb.mxu2 %v1830_v39  ;;  %1234 = vmatpush.bf16.msra.mxu3 %v1509_v18 }
 0xa93   :  { %1145 = vmatpush.bf16.msrb.mxu2 %v1833_v46 }
 0xa97   :  { %1146 = vmatpush.bf16.msrb.mxu2 %v1842_v52 }
 0xa9b   :  { %1147 = vmatpush.bf16.msrb.mxu2 %v1852_v60 }
 0xa9f   :  { %1148 = vmatpush.bf16.msrb.mxu2 %v1862_v4 }
 0xaa3   :  { %1149 = vmatpush.bf16.msrb.mxu2 %v1870_v11 }
 0xaa7   :  { %1150 = vmatpush.bf16.msrb.mxu2 %v1880_v21 }
 0xaab   :  { %1151 = vmatpush.bf16.msrb.mxu2 %v1901_v25 }
 0xaf6   :  { %v893_v17 = vpop.permute.xlu0 %892 }
 0xaf7   :  { %v2168_v13 = vadd.f32 %v893_v17, %v2124_v19  ;;  %v1507_v17 = vld [vmem:[%s2290_s6 + $0x8] sm:$0xff] }
 0xaf9   :  { %938 = vrot.lane.b32.xlu2 %v2168_v13, %s1679_s20 }
 0xb11   :  { %v1005_v39 = vpop.f32.mrf.mxu2 }
 0xb12   :  { %v1009_v46 = vadd.f32 %v1005_v39, %v1951_v42  ;;  %v1506_v39 = vld [vmem:[%s2290_s6] sm:$0xff] }
 0xb14   :  { %1587 = vtanh.f32 %v1009_v46  ;;  %v1012_v14 = vmul.f32 0.5, %v1009_v46 }
 0xb19   :  { %v1007_v52 = vpop.f32.mrf.mxu2 }
 0xb1a   :  { %v1588_v60 = vpop.eup %1587 }
 0xb1b   :  { %v1011_v4 = vadd.f32 1.0, %v1588_v60 }
 0xb1d   :  { %v1016_v11 = vmul.f32 %v1011_v4, %v2154_v63  ;;  %v1178_v4 = vpack.c.bf16 %v2032_v10, %v1978_v58 }
 0xb1f   :  { %v1017_v21 = vadd.f32 %v1016_v11, %v991_v31  ;;  %v1179_v11 = vpack.c.bf16 %v2124_v19, %v2076_v7 }
 0xb21   :  { %1589 = vtanh.f32 %v1017_v21 }
 0xb27   :  { %v1590_v25 = vpop.eup %1589 }
 0xb28   :  { %v1020_v34 = vsub.f32 %v1590_v25, %v2154_v63 }
 0xb2a   :  { %1022 = vrot.lane.b32.xlu1 %v1020_v34, %s1679_s20 }
 0xb53   :  { %v939_v47 = vpop.permute.xlu2 %938 }
 0xb54   :  { %v941_v54 = vsel %vm273_vm0, %v2154_v63, %v939_v47 }
 0xb55   :  { %v942_v62 = vpack.c.bf16 %v941_v54, %v941_v54 }
 0xb57   :  { %951 = vmatmul.bf16.vlgmr.msra.gmra.mxu1 %v942_v62  ;;  %964 = vmatmul.bf16.vlgmr.msra.gmra.mxu0 %v942_v62 }
 0xb9c   :  { %v1023_v35 = vpop.permute.xlu1 %1022 }
 0xbd4   :  { %v952_v42 = vpop.f32.mrf.mxu1  ;;  %v965_v5 = vpop.f32.mrf.mxu0 }
 0xbd5   :  { %v953_v61 = vadd.f32 %v952_v42, %v1962_v51  ;;  %v966_v30 = vadd.f32 %v965_v5, %v1966_v59 }
 0xbd7   :  { %1591 = vtanh.f32 %v953_v61  ;;  %v971_v37 = vmul.f32 0.5, %v953_v61 }
 0xbd8   :  { %1593 = vtanh.f32 %v1012_v14 }
 0xbdc   :  { %v954_v23 = vpop.f32.mrf.mxu1  ;;  %v967_v24 = vpop.f32.mrf.mxu0 }
 0xbdd   :  { %v1592_v26 = vpop.eup %1591 }
 0xbde   :  { %v970_v29 = vadd.f32 1.0, %v1592_v26  ;;  %v1594_v20 = vpop.eup %1593 }
 0xbdf   :  { %v1014_v28 = vadd.f32 1.0, %v1594_v20 }
 0xbe0   :  { %v975_v40 = vmul.f32 %v970_v29, %v2168_v13 }
 0xbe1   :  { %v1015_v32 = vmul.f32 0.5, %v1014_v28 }
 0xbe2   :  { %v976_v16 = vadd.f32 %v975_v40, %v966_v30 }
 0xbe3   :  { %v1019_v36 = vsub.f32 1.0, %v1015_v32 }
 0xbe4   :  { %1595 = vtanh.f32 %v976_v16 }
 0xbe5   :  { %v1025_v43 = vmul.f32 %v1023_v35, %v1019_v36  ;;  %1597 = vtanh.f32 %v971_v37 }
 0xbea   :  { %v1596_v27 = vpop.eup %1595 }
 0xbeb   :  { %v979_v44 = vsub.f32 %v1596_v27, %v2168_v13  ;;  %v1598_v38 = vpop.eup %1597 }
 0xbec   :  { %v973_v41 = vadd.f32 1.0, %v1598_v38 }
 0xbed   :  { %981 = vrot.lane.b32.xlu0 %v979_v44, %s1679_s20 }
 0xbee   :  { %v974_v45 = vmul.f32 0.5, %v973_v41 }
 0xbf0   :  { %v978_v49 = vsub.f32 1.0, %v974_v45 }
 0xbf5   :  { %1027 = vrot.lane.b32.xlu0 %v1025_v43, %s1679_s20 }
 0xc5f   :  { %v982_v50 = vpop.permute.xlu0 %981 }
 0xc60   :  { %v984_v53 = vmul.f32 %v982_v50, %v978_v49 }
 0xc62   :  { %986 = vrot.lane.b32.xlu2 %v984_v53, %s1679_s20 }
 0xc67   :  { %v1028_v56 = vpop.permute.xlu0 %1027 }
 0xc68   :  { %v2186_v55 = vadd.f32 %v1028_v56, %v2154_v63 }
 0xc6a   :  { %v1086_v0 = vpack.c.bf16 %v2186_v55, %v2186_v55 }
 0xc6c   :  { %1448 = vmatmul.msk.bf16.vlgmr.msra.gmra.mxu2 %vm273_vm0, %v1086_v0 }
 0xcbc   :  { %v987_v57 = vpop.permute.xlu2 %986 }
 0xcbd   :  { %v2192_v22 = vadd.f32 %v987_v57, %v2168_v13 }
 0xcbf   :  { %1032 = vrot.lane.b32.xlu1 %v2192_v22, %s1679_s20  ;;  %v1180_v31 = vpack.c.bf16 %v2192_v22, %v2168_v13  ;;  %v2229_v13 = vld [vmem:[%s2291_s7] ss:$0 sm:$0xff] }
 0xcef   :  { %v1099_v2 = vpop.f32.mrf.mxu2 }
 0xcf0   :  { %v1103_v3 = vadd.f32 %v1099_v2, %v1956_v48  ;;  %v1508_v48 = vld [vmem:[%s2290_s6 + $0x10] sm:$0xff] }
 0xcf1   :  { %1235 = vmatpush.bf16.msra.mxu3 %v1508_v48 }
 0xcf2   :  { %1599 = vtanh.f32 %v1103_v3  ;;  %v1106_v54 = vmul.f32 0.5, %v1103_v3 }
 0xcf5   :  { %1236 = vmatpush.bf16.msra.mxu3 %v1507_v17 }
 0xcf7   :  { %v1101_v33 = vpop.f32.mrf.mxu2 }
 0xcf8   :  { %v1600_v6 = vpop.eup %1599 }
 0xcf9   :  { %v1105_v9 = vadd.f32 1.0, %v1600_v6  ;;  %1237 = vmatpush.bf16.msra.mxu3 %v1506_v39 }
 0xcfb   :  { %v1110_v1 = vmul.f32 %v1105_v9, %v2186_v55 }
 0xcfd   :  { %v1111_v15 = vadd.f32 %v1110_v1, %v1085_v12 }
 0xcff   :  { %1601 = vtanh.f32 %v1111_v15 }
 0xd05   :  { %v1602_v8 = vpop.eup %1601 }
 0xd06   :  { %v1114_v63 = vsub.f32 %v1602_v8, %v2186_v55 }
 0xd08   :  { %1116 = vrot.lane.b32.xlu0 %v1114_v63, %s1679_s20 }
 0xd31   :  { %v1033_v46 = vpop.permute.xlu1 %1032 }
 0xd32   :  { %v1035_v52 = vsel %vm273_vm0, %v2186_v55, %v1033_v46 }
 0xd33   :  { %v1036_v60 = vpack.c.bf16 %v1035_v52, %v1035_v52 }
 0xd35   :  { %1045 = vmatmul.bf16.vlgmr.msrb.gmra.mxu3 %v1036_v60  ;;  %1058 = vmatmul.bf16.vlgmr.msrb.gmra.mxu1 %v1036_v60 }
 0xd45   :  { %1465 = vmatmul.msk.bf16.vlgmr.msra.gmra.mxu3 %vm273_vm0, %v1178_v4 }
 0xd55   :  { %1466 = vmatmul.msk.bf16.gmra.mxu3 %vm273_vm0, %v1179_v11 }
 0xd65   :  { %1467 = vmatmul.msk.bf16.gmra.mxu3 %vm273_vm0, %v1180_v31 }
 0xd7a   :  { %v1117_v16 = vpop.permute.xlu0 %1116 }
 0xdb2   :  { %v1059_v21 = vpop.f32.mrf.mxu1 }
 0xdb3   :  { %v1060_v7 = vadd.f32 %v1059_v21, %v1966_v59 }
 0xdb8   :  { %v1046_v25 = vpop.f32.mrf.mxu3 }
 0xdb9   :  { %v1047_v34 = vadd.f32 %v1046_v25, %v1962_v51 }
 0xdba   :  { %v1061_v47 = vpop.f32.mrf.mxu1 }
 0xdbb   :  { %1603 = vtanh.f32 %v1047_v34  ;;  %v1065_v41 = vmul.f32 0.5, %v1047_v34 }
 0xdbc   :  { %1605 = vtanh.f32 %v1106_v54 }
 0xdc0   :  { %v1048_v58 = vpop.f32.mrf.mxu3 }
 0xdc1   :  { %v1604_v10 = vpop.eup %1603 }
 0xdc2   :  { %v1064_v62 = vadd.f32 1.0, %v1604_v10  ;;  %v1606_v14 = vpop.eup %1605 }
 0xdc3   :  { %v1108_v23 = vadd.f32 1.0, %v1606_v14 }
 0xdc4   :  { %v1069_v19 = vmul.f32 %v1064_v62, %v2192_v22 }
 0xdc5   :  { %v1109_v30 = vmul.f32 0.5, %v1108_v23 }
 0xdc6   :  { %v1070_v42 = vadd.f32 %v1069_v19, %v1060_v7 }
 0xdc7   :  { %v1113_v20 = vsub.f32 1.0, %v1109_v30 }
 0xdc8   :  { %1607 = vtanh.f32 %v1070_v42  ;;  %v1239_v5 = vpop.f32.mrf.mxu3 }
 0xdc9   :  { %v1240_v61 = vadd.f32 %v2229_v13, %v1239_v5  ;;  %v1119_v28 = vmul.f32 %v1117_v16, %v1113_v20  ;;  %1609 = vtanh.f32 %v1065_v41 }
 0xdcb   :  { %1259 = vst [vmem:[%s2292_s8] sm:$0xff] %v1240_v61 }
 0xdce   :  { %v1608_v24 = vpop.eup %1607 }
 0xdcf   :  { %v1073_v26 = vsub.f32 %v1608_v24, %v2192_v22  ;;  %v1610_v45 = vpop.eup %1609 }
 0xdd0   :  { %v1241_v29 = vpop.f32.mrf.mxu3  ;;  %v1067_v49 = vadd.f32 1.0, %v1610_v45 }
 0xdd1   :  { %v1242_v40 = vadd.f32 %v2229_v13, %v1241_v29  ;;  %1075 = vrot.lane.b32.xlu2 %v1073_v26, %s1679_s20 }
 0xdd2   :  { %v1068_v50 = vmul.f32 0.5, %v1067_v49 }
 0xdd3   :  { %1260 = vst [vmem:[%s2292_s8 + $0x8] sm:$0xff] %v1242_v40 }
 0xdd4   :  { %v1072_v53 = vsub.f32 1.0, %v1068_v50 }
 0xdd8   :  { %v1244_v27 = vpop.f32.mrf.mxu3 }
 0xdd9   :  { %v1245_v44 = vadd.f32 %v2229_v13, %v1244_v27  ;;  %1121 = vrot.lane.b32.xlu2 %v1119_v28, %s1679_s20 }
 0xddb   :  { %1261 = vst [vmem:[%s2292_s8 + $0x10] sm:$0xff] %v1245_v44 }
 0xde0   :  { %v1246_v32 = vpop.f32.mrf.mxu3 }
 0xde1   :  { %v1247_v35 = vadd.f32 %v2229_v13, %v1246_v32 }
 0xde3   :  { %1262 = vst [vmem:[%s2292_s8 + $0x18] sm:$0xff] %v1247_v35 }
 0xde8   :  { %v1249_v36 = vpop.f32.mrf.mxu3 }
 0xde9   :  { %v1250_v43 = vadd.f32 %v2229_v13, %v1249_v36 }
 0xdeb   :  { %1263 = vst [vmem:[%s2292_s8 + $0x20] sm:$0xff] %v1250_v43 }
 0xdf0   :  { %v1251_v37 = vpop.f32.mrf.mxu3 }
 0xdf1   :  { %v1252_v38 = vadd.f32 %v2229_v13, %v1251_v37 }
 0xdf3   :  { %1264 = vst [vmem:[%s2292_s8 + $0x28] sm:$0xff] %v1252_v38 }
 0xe2b   :  { %v1076_v56 = vpop.permute.xlu2 %1075 }
 0xe2c   :  { %v1078_v0 = vmul.f32 %v1076_v56, %v1072_v53 }
 0xe2e   :  { %1080 = vrot.lane.b32.xlu1 %v1078_v0, %s1679_s20 }
 0xe33   :  { %v1122_v57 = vpop.permute.xlu2 %1121 }
 0xe34   :  { %v1124_v2 = vadd.f32 %v1122_v57, %v2186_v55 }
 0xe36   :  { %1267 = vst.msk [vmem:[%s2293_s9] sm:$0xff] %vm273_vm0, %v1124_v2 }
 0xea0   :  { %v1081_v3 = vpop.permute.xlu1 %1080 }
 0xea1   :  { %v1083_v33 = vadd.f32 %v1081_v3, %v2192_v22 }
 0xea3   :  { %1126 = vrot.lane.b32.xlu0 %v1083_v33, %s1679_s20 }
 0xf15   :  { %v1127_v6 = vpop.permute.xlu0 %1126 }
 0xf16   :  { %v1129_v9 = vsel %vm273_vm0, %v1124_v2, %v1127_v6 }
 0xf17   :  { %v1130_v1 = vpack.c.bf16 %v1129_v9, %v1129_v9 }
 0xf19   :  { %1139 = vmatmul.bf16.vlgmr.msrb.gmra.mxu0 %v1130_v1  ;;  %1152 = vmatmul.bf16.vlgmr.msrb.gmra.mxu2 %v1130_v1 }
 0xf96   :  { %v1140_v12 = vpop.f32.mrf.mxu0 }
 0xf97   :  { %v1141_v15 = vadd.f32 %v1140_v12, %v1962_v51 }
 0xf99   :  { %1611 = vtanh.f32 %v1141_v15  ;;  %v1159_v60 = vmul.f32 0.5, %v1141_v15 }
 0xf9c   :  { %v1153_v55 = vpop.f32.mrf.mxu2 }
 0xf9d   :  { %v1154_v48 = vadd.f32 %v1153_v55, %v1966_v59 }
 0xf9e   :  { %v1142_v8 = vpop.f32.mrf.mxu0 }
 0xf9f   :  { %v1612_v63 = vpop.eup %1611 }
 0xfa0   :  { %v1158_v18 = vadd.f32 1.0, %v1612_v63 }
 0xfa2   :  { %v1163_v17 = vmul.f32 %v1158_v18, %v1083_v33 }
 0xfa4   :  { %v1164_v22 = vadd.f32 %v1163_v17, %v1154_v48  ;;  %v1155_v39 = vpop.f32.mrf.mxu2 }
 0xfa6   :  { %1613 = vtanh.f32 %v1164_v22 }
 0xfa7   :  { %1615 = vtanh.f32 %v1159_v60 }
 0xfac   :  { %v1614_v46 = vpop.eup %1613 }
 0xfad   :  { %v1167_v52 = vsub.f32 %v1614_v46, %v1083_v33  ;;  %v1616_v4 = vpop.eup %1615 }
 0xfae   :  { %v1161_v11 = vadd.f32 1.0, %v1616_v4 }
 0xfaf   :  { %1169 = vrot.lane.b32.xlu1 %v1167_v52, %s1679_s20 }
 0xfb0   :  { %v1162_v51 = vmul.f32 0.5, %v1161_v11 }
 0xfb2   :  { %v1166_v31 = vsub.f32 1.0, %v1162_v51 }
0x1021   :  { %v1170_v21 = vpop.permute.xlu1 %1169 }
0x1022   :  { %v1172_v25 = vmul.f32 %v1170_v21, %v1166_v31 }
0x1024   :  { %1174 = vrot.lane.b32.xlu2 %v1172_v25, %s1679_s20 }
0x107e   :  { %v1175_v34 = vpop.permute.xlu2 %1174 }
0x107f   :  { %v1177_v59 = vadd.f32 %v1175_v34, %v1083_v33 }
0x1081   :  { %v1181_v47 = vpack.c.bf16 %v1177_v59, %v1083_v33  ;;  %1469 = vst.msk [vmem:[%s2293_s9 + $0x8] sm:$0xff] %vm273_vm0, %v1177_v59 }
0x1083   :  { %1468 = vmatmul.msk.bf16.gmra.mxu3 %vm273_vm0, %v1181_v47 }
0x1106   :  { %v1254_v54 = vpop.f32.mrf.mxu3 }
0x1107   :  { %v1255_v58 = vadd.f32 %v2229_v13, %v1254_v54 }
0x1109   :  { %1265 = vst [vmem:[%s2292_s8 + $0x30] sm:$0xff] %v1255_v58 }
0x110e   :  { %v1256_v10 = vpop.f32.mrf.mxu3 }
0x110f   :  { %v1257_v62 = vadd.f32 %v2229_v13, %v1256_v10 }
0x1111   :  { %1266 = vst [vmem:[%s2292_s8 + $0x38] sm:$0xff] %v1257_v62 }
0x1112   :  { %1278 = vsyncpa [#allocation4], 1 }
0x1113   :  { %1279 = vsyncpa [#allocation6], 1 }

</bundles_post_ra>
